<compile_context>
chip_gen: v7x
topology: tpu7x:2x2x1
jax: 0.10.0
libtpu: 0.0.40
codegen_flags: <defaults>
</compile_context>

<pallas_src>
import functools

import jax
import jax.numpy as jnp
from jax.experimental import pallas as pl
from jax.experimental.pallas import tpu as pltpu


def _attn_subblock_kernel(num_heads, eps,
                          x_ref, g_ref, b_ref,
                          wqkv_ref, bqkv_ref, wo_ref, bo_ref,
                          out_ref, wsum_ref, acc_ref):
    """TB packed batch elements per grid step: LayerNorm + fused-QKV MHA
    self-attention with the output projection folded into the head loop, plus
    the head-averaged attention weights summed over the query axis."""
    TB, L, D = x_ref.shape
    hd = D // num_heads
    scale = 1.0 / float(hd) ** 0.5
    cdt = jnp.dtype(wqkv_ref.dtype)                    # MXU operand dtype (bf16/f32)
    approx_recip = cdt == jnp.dtype(jnp.bfloat16)

    # --- LayerNorm(dim, eps=1e-6, elementwise_affine=True); stats in f32 ---
    x = x_ref[...].reshape(TB * L, D).astype(jnp.float32)
    mean = jnp.mean(x, axis=-1, keepdims=True)
    var = jnp.mean((x - mean) ** 2, axis=-1, keepdims=True)
    xn = (x - mean) * jax.lax.rsqrt(var + eps)
    xn = xn * g_ref[0].astype(jnp.float32) + b_ref[0].astype(jnp.float32)

    # --- fused QKV projection: one (TB*L, D) @ (D, 3D) MXU pass, f32 accum ---
    qkv = jnp.dot(xn.astype(cdt), wqkv_ref[...],
                  preferred_element_type=jnp.float32) + bqkv_ref[0].astype(jnp.float32)

    # --- per-head attention; Wo contribution accumulated per head (no concat) ---
    acc_ref[...] = jnp.zeros_like(acc_ref)             # (TB*L, D) f32 accumulator
    wsum = jnp.zeros((TB, L), jnp.float32)
    for h in range(num_heads):                          # static unrolled head loop
        lo = h * hd
        qh = qkv[:, lo:lo + hd].reshape(TB, L, hd)
        kh = qkv[:, D + lo:D + lo + hd].reshape(TB, L, hd)
        vh = qkv[:, 2 * D + lo:2 * D + lo + hd].reshape(TB, L, hd)
        s = jnp.einsum('bqd,bkd->bqk', qh.astype(cdt), kh.astype(cdt),
                       preferred_element_type=jnp.float32) * scale
        s = s - jnp.max(s, axis=-1, keepdims=True)      # f32 softmax
        e = jnp.exp(s)
        p = e * pl.reciprocal(jnp.sum(e, axis=-1, keepdims=True), approx=approx_recip)
        oh = jnp.einsum('bqk,bkd->bqd', p.astype(cdt), vh.astype(cdt),
                        preferred_element_type=jnp.float32)      # (TB, L, hd)
        # output-projection contribution of this head: (TB*L, hd) @ (hd, D)
        acc_ref[...] += jnp.dot(oh.reshape(TB * L, hd).astype(cdt),
                                wo_ref[lo:lo + hd, :],
                                preferred_element_type=jnp.float32)
        wsum = wsum + jnp.sum(p, axis=1)                # sum over query axis

    o = acc_ref[...] + bo_ref[0].astype(jnp.float32)
    out_ref[...] = o.reshape(TB, L, D).astype(out_ref.dtype)
    # need_weights=True averages weights over heads; forward() then sums over
    # dim=1 (queries) -> per-key importance score of shape (L,).
    wsum_ref[0] = (wsum * (1.0 / num_heads)).astype(wsum_ref.dtype)


def _pick_batch_tile(batch, seq_len, target_rows=512):
    """Largest divisor of `batch` whose packed row count TB*L stays <= target."""
    tb = 1
    for cand in range(1, batch + 1):
        if batch % cand == 0 and cand * seq_len <= max(target_rows, seq_len):
            tb = cand
    return tb


def attention_sub_block_core(x, params, *, num_heads, compute_dtype=jnp.bfloat16):
    """Pallas hot path: returns (attn_out (B,L,D), key_scores (B,L))."""
    B, L, D = x.shape
    assert D % num_heads == 0, "embedding dim must be divisible by num_heads"
    gamma, beta, wqkv_t, bqkv, wo_t, bo = params
    g2, b2 = gamma.reshape(1, D), beta.reshape(1, D)
    bqkv2 = bqkv.reshape(1, 3 * D).astype(jnp.float32)
    bo2 = bo.reshape(1, D).astype(jnp.float32)
    # MXU operands carried in compute_dtype (bf16 on v6e/v7x); accumulation f32.
    wqkv_c = wqkv_t.astype(compute_dtype)
    wo_c = wo_t.astype(compute_dtype)

    tb = _pick_batch_tile(B, L)
    grid = (B // tb,)

    kernel = functools.partial(_attn_subblock_kernel, num_heads, 1e-6)

    def bcast(shape):
        return pl.BlockSpec(shape, lambda g: (0,) * len(shape))

    out, wsum3 = pl.pallas_call(
        kernel,
        out_shape=(jax.ShapeDtypeStruct((B, L, D), x.dtype),
                   jax.ShapeDtypeStruct((B // tb, tb, L), jnp.float32)),
        grid_spec=pltpu.PrefetchScalarGridSpec(
            num_scalar_prefetch=0,
            grid=grid,
            in_specs=[
                pl.BlockSpec((tb, L, D), lambda g: (g, 0, 0)),   # x (packed batch)
                bcast((1, D)), bcast((1, D)),                    # ln gamma, beta
                bcast((D, 3 * D)), bcast((1, 3 * D)),            # fused Wqkv^T, bqkv
                bcast((D, D)), bcast((1, D)),                    # Wo^T, bo
            ],
            out_specs=[
                pl.BlockSpec((tb, L, D), lambda g: (g, 0, 0)),
                pl.BlockSpec((1, tb, L), lambda g: (g, 0, 0)),
            ],
            scratch_shapes=[pltpu.VMEM((tb * L, D), jnp.float32)],
        ),
        compiler_params=pltpu.CompilerParams(
            dimension_semantics=("parallel",),
            vmem_limit_bytes=32 * 1024 * 1024,
        ),
    )(x, g2, b2, wqkv_c, bqkv2, wo_c, bo2)
    return out, wsum3.reshape(B, L)


def attention_sub_block(x, params, *, num_heads, keep_eta,
                        compute_dtype=jnp.bfloat16):
    B, L, D = x.shape
    out, wsum = attention_sub_block_core(x, params, num_heads=num_heads,
                                         compute_dtype=compute_dtype)
    k = int(keep_eta * L)
    # TODO(synk): reference has ipdb.set_trace() (debug breakpoint) — no-op, omitted.
    # torch.topk(..., sorted=False): the index *set* is what matters; lax.top_k's
    # sorted order is an equally valid selection.
    _, topk_idx = jax.lax.top_k(wsum, k)                         # (B, k)
    idx_full = jnp.broadcast_to(topk_idx[:, :, None], (B, k, D)).astype(jnp.int32)
    out_g = jnp.take_along_axis(out, idx_full, axis=1)           # gather kept tokens
    return out_g, idx_full


def _reference_core(x, params, num_heads):
    """Pure-JAX reference of LayerNorm + MHA (for verification only)."""
    gamma, beta, wqkv_t, bqkv, wo_t, bo = params
    B, L, D = x.shape
    hd = D // num_heads
    mean = jnp.mean(x, axis=-1, keepdims=True)
    var = jnp.mean((x - mean) ** 2, axis=-1, keepdims=True)
    xn = (x - mean) / jnp.sqrt(var + 1e-6) * gamma + beta
    qkv = xn @ wqkv_t + bqkv
    q, k, v = qkv[..., :D], qkv[..., D:2 * D], qkv[..., 2 * D:]
    qh = q.reshape(B, L, num_heads, hd).transpose(0, 2, 1, 3)
    kh = k.reshape(B, L, num_heads, hd).transpose(0, 2, 1, 3)
    vh = v.reshape(B, L, num_heads, hd).transpose(0, 2, 1, 3)
    s = jnp.einsum("bhqd,bhkd->bhqk", qh, kh) / jnp.sqrt(hd)
    p = jax.nn.softmax(s, axis=-1)
    o = jnp.einsum("bhqk,bhkd->bhqd", p, vh).transpose(0, 2, 1, 3).reshape(B, L, D)
    o = o @ wo_t + bo
    wsum = p.mean(axis=1).sum(axis=1)                            # (B, L)
    return o, wsum


if __name__ == "__main__":
    B, L, D, H = 2, 8, 32, 4
    keep_eta = 0.5

    key = jax.random.PRNGKey(0)
    ks = jax.random.split(key, 8)
    x = jax.random.normal(ks[0], (B, L, D), jnp.float32)

    # Deterministic synthetic parameters (shapes match nn.LayerNorm + nn.MultiheadAttention).
    gamma = jnp.ones((D,), jnp.float32) + 0.01 * jax.random.normal(ks[1], (D,))
    beta = 0.01 * jax.random.normal(ks[2], (D,))
    in_proj_w = jax.random.normal(ks[3], (3 * D, D), jnp.float32) * (1.0 / jnp.sqrt(D))
    in_proj_b = 0.01 * jax.random.normal(ks[4], (3 * D,), jnp.float32)
    out_proj_w = jax.random.normal(ks[5], (D, D), jnp.float32) * (1.0 / jnp.sqrt(D))
    out_proj_b = 0.01 * jax.random.normal(ks[6], (D,), jnp.float32)

    # PyTorch Linear computes x @ W^T; pre-transpose + fuse q|k|v weights (glue).
    wqkv_t = in_proj_w.T                                         # (D, 3D): q | k | v
    params = (gamma, beta, wqkv_t, in_proj_b, out_proj_w.T, out_proj_b)

    # Run the Pallas kernel path (bf16 MXU operands — production config).
    out_kept, topk_idx = attention_sub_block(x, params, num_heads=H, keep_eta=keep_eta)
    out_kept = jax.block_until_ready(out_kept)
    topk_idx = jax.block_until_ready(topk_idx)
    assert out_kept.shape == (B, int(keep_eta * L), D)
    assert topk_idx.shape == (B, int(keep_eta * L), D)

    # Verify the kernel core against a pure-JAX reference.
    out_r, wsum_r = _reference_core(x, params, H)

    # (1) f32 MXU-operand path: tight numerical check.
    out_f32, wsum_f32 = attention_sub_block_core(x, params, num_heads=H,
                                                 compute_dtype=jnp.float32)
    assert jnp.allclose(out_f32, out_r, rtol=1e-4, atol=1e-4)
    assert jnp.allclose(wsum_f32, wsum_r, rtol=1e-4, atol=1e-4)

    # (2) bf16 MXU-operand path: bf16-level tolerance (softmax math stays f32).
    out_bf, wsum_bf = attention_sub_block_core(x, params, num_heads=H,
                                               compute_dtype=jnp.bfloat16)
    assert jnp.allclose(out_bf, out_r, rtol=5e-2, atol=5e-2)
    assert jnp.allclose(wsum_bf, wsum_r, rtol=5e-2, atol=5e-2)

    print("KERNEL_OK")
</pallas_src>

<mosaic_0001>
module attributes {stable_mosaic.version = 11 : i64} {
  func.func @_attn_subblock_kernel(%arg0: i32, %arg1: memref<2x8x32xf32, #tpu.memory_space<vmem>>, %arg2: memref<1x32xf32, #tpu.memory_space<vmem>>, %arg3: memref<1x32xf32, #tpu.memory_space<vmem>>, %arg4: memref<32x96xbf16, #tpu.memory_space<vmem>>, %arg5: memref<1x96xf32, #tpu.memory_space<vmem>>, %arg6: memref<32x32xbf16, #tpu.memory_space<vmem>>, %arg7: memref<1x32xf32, #tpu.memory_space<vmem>>, %arg8: memref<2x8x32xf32, #tpu.memory_space<vmem>>, %arg9: memref<1x2x8xf32, #tpu.memory_space<vmem>>, %arg10: memref<16x32xf32, #tpu.memory_space<vmem>>) attributes {dimension_semantics = [#tpu.dimension_semantics<parallel>], iteration_bounds = array<i64: 1>, scalar_prefetch = 0 : i64, scratch_operands = 1 : i64, tpu.core_type = #tpu.core_type<tc>, window_params = [{transform_indices = @transform_0, window_bounds = array<i64: 2, 8, 32>}, {pipeline_mode = #tpu.pipeline_mode<synchronous>, transform_indices = @transform_1, window_bounds = array<i64: 1, 32>}, {pipeline_mode = #tpu.pipeline_mode<synchronous>, transform_indices = @transform_2, window_bounds = array<i64: 1, 32>}, {pipeline_mode = #tpu.pipeline_mode<synchronous>, transform_indices = @transform_3, window_bounds = array<i64: 32, 96>}, {pipeline_mode = #tpu.pipeline_mode<synchronous>, transform_indices = @transform_4, window_bounds = array<i64: 1, 96>}, {pipeline_mode = #tpu.pipeline_mode<synchronous>, transform_indices = @transform_5, window_bounds = array<i64: 32, 32>}, {pipeline_mode = #tpu.pipeline_mode<synchronous>, transform_indices = @transform_6, window_bounds = array<i64: 1, 32>}, {transform_indices = @transform_7, window_bounds = array<i64: 2, 8, 32>}, {transform_indices = @transform_8, window_bounds = array<i64: 1, 2, 8>}]} {
    %c0 = arith.constant 0 : index
    %c0_0 = arith.constant 0 : index
    %c0_1 = arith.constant 0 : index
    %0 = vector.load %arg1[%c0, %c0_0, %c0_1] : memref<2x8x32xf32, #tpu.memory_space<vmem>>, vector<2x8x32xf32>
    %1 = vector.shape_cast %0 : vector<2x8x32xf32> to vector<16x32xf32>
    %cst = arith.constant dense<0.000000e+00> : vector<16xf32>
    %2 = vector.multi_reduction <add>, %1, %cst [1] : vector<16x32xf32> to vector<16xf32>
    %3 = vector.shape_cast %2 : vector<16xf32> to vector<16x1xf32>
    %cst_2 = arith.constant 3.200000e+01 : f32
    %4 = vector.broadcast %cst_2 : f32 to vector<16x1xf32>
    %5 = arith.divf %3, %4 : vector<16x1xf32>
    %6 = vector.broadcast %5 : vector<16x1xf32> to vector<16x32xf32>
    %7 = arith.subf %1, %6 : vector<16x32xf32>
    %8 = arith.mulf %7, %7 : vector<16x32xf32>
    %cst_3 = arith.constant dense<0.000000e+00> : vector<16xf32>
    %9 = vector.multi_reduction <add>, %8, %cst_3 [1] : vector<16x32xf32> to vector<16xf32>
    %10 = vector.shape_cast %9 : vector<16xf32> to vector<16x1xf32>
    %cst_4 = arith.constant 3.200000e+01 : f32
    %11 = vector.broadcast %cst_4 : f32 to vector<16x1xf32>
    %12 = arith.divf %10, %11 : vector<16x1xf32>
    %13 = vector.broadcast %5 : vector<16x1xf32> to vector<16x32xf32>
    %14 = arith.subf %1, %13 : vector<16x32xf32>
    %cst_5 = arith.constant 9.99999997E-7 : f32
    %15 = vector.broadcast %cst_5 : f32 to vector<16x1xf32>
    %16 = arith.addf %12, %15 : vector<16x1xf32>
    %17 = math.rsqrt %16 : vector<16x1xf32>
    %18 = vector.broadcast %17 : vector<16x1xf32> to vector<16x32xf32>
    %19 = arith.mulf %14, %18 : vector<16x32xf32>
    %c0_6 = arith.constant 0 : index
    %c0_7 = arith.constant 0 : index
    %20 = vector.load %arg2[%c0_6, %c0_7] : memref<1x32xf32, #tpu.memory_space<vmem>>, vector<1x32xf32>
    %21 = vector.shape_cast %20 : vector<1x32xf32> to vector<32xf32>
    %22 = vector.shape_cast %21 : vector<32xf32> to vector<1x32xf32>
    %23 = vector.broadcast %22 : vector<1x32xf32> to vector<16x32xf32>
    %24 = arith.mulf %19, %23 : vector<16x32xf32>
    %c0_8 = arith.constant 0 : index
    %c0_9 = arith.constant 0 : index
    %25 = vector.load %arg3[%c0_8, %c0_9] : memref<1x32xf32, #tpu.memory_space<vmem>>, vector<1x32xf32>
    %26 = vector.shape_cast %25 : vector<1x32xf32> to vector<32xf32>
    %27 = vector.shape_cast %26 : vector<32xf32> to vector<1x32xf32>
    %28 = vector.broadcast %27 : vector<1x32xf32> to vector<16x32xf32>
    %29 = arith.addf %24, %28 : vector<16x32xf32>
    %30 = arith.truncf %29 : vector<16x32xf32> to vector<16x32xbf16>
    %c0_10 = arith.constant 0 : index
    %c0_11 = arith.constant 0 : index
    %31 = vector.load %arg4[%c0_10, %c0_11] : memref<32x96xbf16, #tpu.memory_space<vmem>>, vector<32x96xbf16>
    %cst_12 = arith.constant dense<0.000000e+00> : vector<16x96xf32>
    %32 = tpu.matmul %30, %31, %cst_12 {dimension_numbers = #tpu.dot_dimension_numbers<[1], [0], [0], [1], [0, 0, 1, 1], [], []>} : vector<16x32xbf16>, vector<32x96xbf16>, vector<16x96xf32> -> vector<16x96xf32>
    %c0_13 = arith.constant 0 : index
    %c0_14 = arith.constant 0 : index
    %33 = vector.load %arg5[%c0_13, %c0_14] : memref<1x96xf32, #tpu.memory_space<vmem>>, vector<1x96xf32>
    %34 = vector.shape_cast %33 : vector<1x96xf32> to vector<96xf32>
    %35 = vector.shape_cast %34 : vector<96xf32> to vector<1x96xf32>
    %36 = vector.broadcast %35 : vector<1x96xf32> to vector<16x96xf32>
    %37 = arith.addf %32, %36 : vector<16x96xf32>
    %cst_15 = arith.constant 0.000000e+00 : f32
    %38 = vector.broadcast %cst_15 : f32 to vector<16x32xf32>
    %c0_16 = arith.constant 0 : index
    %c0_17 = arith.constant 0 : index
    %39 = vector.load %arg10[%c0_16, %c0_17] : memref<16x32xf32, #tpu.memory_space<vmem>>, vector<16x32xf32>
    tpu.vector_store %arg10[%c0_16, %c0_17], %38 {strides = array<i32>} : memref<16x32xf32, #tpu.memory_space<vmem>>, vector<16x32xf32>,
    %cst_18 = arith.constant 0.000000e+00 : f32
    %40 = vector.broadcast %cst_18 : f32 to vector<2x8xf32>
    %41 = vector.extract_strided_slice %37 {offsets = [0, 0], sizes = [16, 8], strides = [1, 1]} : vector<16x96xf32> to vector<16x8xf32>
    %42 = vector.shape_cast %41 : vector<16x8xf32> to vector<2x8x8xf32>
    %43 = vector.extract_strided_slice %37 {offsets = [0, 32], sizes = [16, 8], strides = [1, 1]} : vector<16x96xf32> to vector<16x8xf32>
    %44 = vector.shape_cast %43 : vector<16x8xf32> to vector<2x8x8xf32>
    %45 = vector.extract_strided_slice %37 {offsets = [0, 64], sizes = [16, 8], strides = [1, 1]} : vector<16x96xf32> to vector<16x8xf32>
    %46 = vector.shape_cast %45 : vector<16x8xf32> to vector<2x8x8xf32>
    %47 = arith.truncf %42 : vector<2x8x8xf32> to vector<2x8x8xbf16>
    %48 = arith.truncf %44 : vector<2x8x8xf32> to vector<2x8x8xbf16>
    "tpu.trace_start"() <{level = 10 : i32, message = "bqd,bkd->bqk"}> : () -> ()
    %cst_19 = arith.constant dense<0.000000e+00> : vector<2x8x8xf32>
    %49 = tpu.matmul %47, %48, %cst_19 {dimension_numbers = #tpu.dot_dimension_numbers<[2], [2], [1], [1], [0, 0, 0, 1, 1, 1], [0], [0]>} : vector<2x8x8xbf16>, vector<2x8x8xbf16>, vector<2x8x8xf32> -> vector<2x8x8xf32>
    "tpu.trace_stop"() : () -> ()
    %cst_20 = arith.constant 0.353553385 : f32
    %50 = vector.broadcast %cst_20 : f32 to vector<2x8x8xf32>
    %51 = arith.mulf %49, %50 : vector<2x8x8xf32>
    %cst_21 = arith.constant dense<0xFF800000> : vector<2x8xf32>
    %52 = vector.multi_reduction <maximumf>, %51, %cst_21 [2] : vector<2x8x8xf32> to vector<2x8xf32>
    %53 = vector.shape_cast %52 : vector<2x8xf32> to vector<2x8x1xf32>
    %54 = vector.broadcast %53 : vector<2x8x1xf32> to vector<2x8x8xf32>
    %55 = arith.subf %51, %54 : vector<2x8x8xf32>
    %56 = math.exp %55 : vector<2x8x8xf32>
    %cst_22 = arith.constant dense<0.000000e+00> : vector<2x8xf32>
    %57 = vector.multi_reduction <add>, %56, %cst_22 [2] : vector<2x8x8xf32> to vector<2x8xf32>
    %58 = vector.shape_cast %57 : vector<2x8xf32> to vector<2x8x1xf32>
    %59 = tpu.reciprocal %58 {approx = true} : vector<2x8x1xf32> -> vector<2x8x1xf32>
    %60 = vector.broadcast %59 : vector<2x8x1xf32> to vector<2x8x8xf32>
    %61 = arith.mulf %56, %60 : vector<2x8x8xf32>
    %62 = arith.truncf %61 : vector<2x8x8xf32> to vector<2x8x8xbf16>
    %63 = arith.truncf %46 : vector<2x8x8xf32> to vector<2x8x8xbf16>
    "tpu.trace_start"() <{level = 10 : i32, message = "bqk,bkd->bqd"}> : () -> ()
    %cst_23 = arith.constant dense<0.000000e+00> : vector<2x8x8xf32>
    %64 = tpu.matmul %62, %63, %cst_23 {dimension_numbers = #tpu.dot_dimension_numbers<[2], [1], [1], [2], [0, 0, 0, 1, 1, 2], [0], [0]>} : vector<2x8x8xbf16>, vector<2x8x8xbf16>, vector<2x8x8xf32> -> vector<2x8x8xf32>
    "tpu.trace_stop"() : () -> ()
    %c0_24 = arith.constant 0 : index
    %c0_25 = arith.constant 0 : index
    %65 = vector.load %arg10[%c0_24, %c0_25] : memref<16x32xf32, #tpu.memory_space<vmem>>, vector<16x32xf32>
    %66 = vector.shape_cast %64 : vector<2x8x8xf32> to vector<16x8xf32>
    %67 = arith.truncf %66 : vector<16x8xf32> to vector<16x8xbf16>
    %c0_26 = arith.constant 0 : index
    %c0_27 = arith.constant 0 : index
    %68 = vector.load %arg6[%c0_26, %c0_27] : memref<32x32xbf16, #tpu.memory_space<vmem>>, vector<8x32xbf16>
    %cst_28 = arith.constant dense<0.000000e+00> : vector<16x32xf32>
    %69 = tpu.matmul %67, %68, %cst_28 {dimension_numbers = #tpu.dot_dimension_numbers<[1], [0], [0], [1], [0, 0, 1, 1], [], []>} : vector<16x8xbf16>, vector<8x32xbf16>, vector<16x32xf32> -> vector<16x32xf32>
    %70 = arith.addf %65, %69 : vector<16x32xf32>
    %c0_29 = arith.constant 0 : index
    %c0_30 = arith.constant 0 : index
    %71 = vector.load %arg10[%c0_29, %c0_30] : memref<16x32xf32, #tpu.memory_space<vmem>>, vector<16x32xf32>
    tpu.vector_store %arg10[%c0_29, %c0_30], %70 {strides = array<i32>} : memref<16x32xf32, #tpu.memory_space<vmem>>, vector<16x32xf32>,
    %cst_31 = arith.constant dense<0.000000e+00> : vector<2x8xf32>
    %72 = vector.multi_reduction <add>, %61, %cst_31 [1] : vector<2x8x8xf32> to vector<2x8xf32>
    %73 = arith.addf %40, %72 : vector<2x8xf32>
    %74 = vector.extract_strided_slice %37 {offsets = [0, 8], sizes = [16, 8], strides = [1, 1]} : vector<16x96xf32> to vector<16x8xf32>
    %75 = vector.shape_cast %74 : vector<16x8xf32> to vector<2x8x8xf32>
    %76 = vector.extract_strided_slice %37 {offsets = [0, 40], sizes = [16, 8], strides = [1, 1]} : vector<16x96xf32> to vector<16x8xf32>
    %77 = vector.shape_cast %76 : vector<16x8xf32> to vector<2x8x8xf32>
    %78 = vector.extract_strided_slice %37 {offsets = [0, 72], sizes = [16, 8], strides = [1, 1]} : vector<16x96xf32> to vector<16x8xf32>
    %79 = vector.shape_cast %78 : vector<16x8xf32> to vector<2x8x8xf32>
    %80 = arith.truncf %75 : vector<2x8x8xf32> to vector<2x8x8xbf16>
    %81 = arith.truncf %77 : vector<2x8x8xf32> to vector<2x8x8xbf16>
    "tpu.trace_start"() <{level = 10 : i32, message = "bqd,bkd->bqk"}> : () -> ()
    %cst_32 = arith.constant dense<0.000000e+00> : vector<2x8x8xf32>
    %82 = tpu.matmul %80, %81, %cst_32 {dimension_numbers = #tpu.dot_dimension_numbers<[2], [2], [1], [1], [0, 0, 0, 1, 1, 1], [0], [0]>} : vector<2x8x8xbf16>, vector<2x8x8xbf16>, vector<2x8x8xf32> -> vector<2x8x8xf32>
    "tpu.trace_stop"() : () -> ()
    %cst_33 = arith.constant 0.353553385 : f32
    %83 = vector.broadcast %cst_33 : f32 to vector<2x8x8xf32>
    %84 = arith.mulf %82, %83 : vector<2x8x8xf32>
    %cst_34 = arith.constant dense<0xFF800000> : vector<2x8xf32>
    %85 = vector.multi_reduction <maximumf>, %84, %cst_34 [2] : vector<2x8x8xf32> to vector<2x8xf32>
    %86 = vector.shape_cast %85 : vector<2x8xf32> to vector<2x8x1xf32>
    %87 = vector.broadcast %86 : vector<2x8x1xf32> to vector<2x8x8xf32>
    %88 = arith.subf %84, %87 : vector<2x8x8xf32>
    %89 = math.exp %88 : vector<2x8x8xf32>
    %cst_35 = arith.constant dense<0.000000e+00> : vector<2x8xf32>
    %90 = vector.multi_reduction <add>, %89, %cst_35 [2] : vector<2x8x8xf32> to vector<2x8xf32>
    %91 = vector.shape_cast %90 : vector<2x8xf32> to vector<2x8x1xf32>
    %92 = tpu.reciprocal %91 {approx = true} : vector<2x8x1xf32> -> vector<2x8x1xf32>
    %93 = vector.broadcast %92 : vector<2x8x1xf32> to vector<2x8x8xf32>
    %94 = arith.mulf %89, %93 : vector<2x8x8xf32>
    %95 = arith.truncf %94 : vector<2x8x8xf32> to vector<2x8x8xbf16>
    %96 = arith.truncf %79 : vector<2x8x8xf32> to vector<2x8x8xbf16>
    "tpu.trace_start"() <{level = 10 : i32, message = "bqk,bkd->bqd"}> : () -> ()
    %cst_36 = arith.constant dense<0.000000e+00> : vector<2x8x8xf32>
    %97 = tpu.matmul %95, %96, %cst_36 {dimension_numbers = #tpu.dot_dimension_numbers<[2], [1], [1], [2], [0, 0, 0, 1, 1, 2], [0], [0]>} : vector<2x8x8xbf16>, vector<2x8x8xbf16>, vector<2x8x8xf32> -> vector<2x8x8xf32>
    "tpu.trace_stop"() : () -> ()
    %c0_37 = arith.constant 0 : index
    %c0_38 = arith.constant 0 : index
    %98 = vector.load %arg10[%c0_37, %c0_38] : memref<16x32xf32, #tpu.memory_space<vmem>>, vector<16x32xf32>
    %99 = vector.shape_cast %97 : vector<2x8x8xf32> to vector<16x8xf32>
    %100 = arith.truncf %99 : vector<16x8xf32> to vector<16x8xbf16>
    %c8 = arith.constant 8 : index
    %c0_39 = arith.constant 0 : index
    %101 = vector.load %arg6[%c8, %c0_39] : memref<32x32xbf16, #tpu.memory_space<vmem>>, vector<8x32xbf16>
    %cst_40 = arith.constant dense<0.000000e+00> : vector<16x32xf32>
    %102 = tpu.matmul %100, %101, %cst_40 {dimension_numbers = #tpu.dot_dimension_numbers<[1], [0], [0], [1], [0, 0, 1, 1], [], []>} : vector<16x8xbf16>, vector<8x32xbf16>, vector<16x32xf32> -> vector<16x32xf32>
    %103 = arith.addf %98, %102 : vector<16x32xf32>
    %c0_41 = arith.constant 0 : index
    %c0_42 = arith.constant 0 : index
    %104 = vector.load %arg10[%c0_41, %c0_42] : memref<16x32xf32, #tpu.memory_space<vmem>>, vector<16x32xf32>
    tpu.vector_store %arg10[%c0_41, %c0_42], %103 {strides = array<i32>} : memref<16x32xf32, #tpu.memory_space<vmem>>, vector<16x32xf32>,
    %cst_43 = arith.constant dense<0.000000e+00> : vector<2x8xf32>
    %105 = vector.multi_reduction <add>, %94, %cst_43 [1] : vector<2x8x8xf32> to vector<2x8xf32>
    %106 = arith.addf %73, %105 : vector<2x8xf32>
    %107 = vector.extract_strided_slice %37 {offsets = [0, 16], sizes = [16, 8], strides = [1, 1]} : vector<16x96xf32> to vector<16x8xf32>
    %108 = vector.shape_cast %107 : vector<16x8xf32> to vector<2x8x8xf32>
    %109 = vector.extract_strided_slice %37 {offsets = [0, 48], sizes = [16, 8], strides = [1, 1]} : vector<16x96xf32> to vector<16x8xf32>
    %110 = vector.shape_cast %109 : vector<16x8xf32> to vector<2x8x8xf32>
    %111 = vector.extract_strided_slice %37 {offsets = [0, 80], sizes = [16, 8], strides = [1, 1]} : vector<16x96xf32> to vector<16x8xf32>
    %112 = vector.shape_cast %111 : vector<16x8xf32> to vector<2x8x8xf32>
    %113 = arith.truncf %108 : vector<2x8x8xf32> to vector<2x8x8xbf16>
    %114 = arith.truncf %110 : vector<2x8x8xf32> to vector<2x8x8xbf16>
    "tpu.trace_start"() <{level = 10 : i32, message = "bqd,bkd->bqk"}> : () -> ()
    %cst_44 = arith.constant dense<0.000000e+00> : vector<2x8x8xf32>
    %115 = tpu.matmul %113, %114, %cst_44 {dimension_numbers = #tpu.dot_dimension_numbers<[2], [2], [1], [1], [0, 0, 0, 1, 1, 1], [0], [0]>} : vector<2x8x8xbf16>, vector<2x8x8xbf16>, vector<2x8x8xf32> -> vector<2x8x8xf32>
    "tpu.trace_stop"() : () -> ()
    %cst_45 = arith.constant 0.353553385 : f32
    %116 = vector.broadcast %cst_45 : f32 to vector<2x8x8xf32>
    %117 = arith.mulf %115, %116 : vector<2x8x8xf32>
    %cst_46 = arith.constant dense<0xFF800000> : vector<2x8xf32>
    %118 = vector.multi_reduction <maximumf>, %117, %cst_46 [2] : vector<2x8x8xf32> to vector<2x8xf32>
    %119 = vector.shape_cast %118 : vector<2x8xf32> to vector<2x8x1xf32>
    %120 = vector.broadcast %119 : vector<2x8x1xf32> to vector<2x8x8xf32>
    %121 = arith.subf %117, %120 : vector<2x8x8xf32>
    %122 = math.exp %121 : vector<2x8x8xf32>
    %cst_47 = arith.constant dense<0.000000e+00> : vector<2x8xf32>
    %123 = vector.multi_reduction <add>, %122, %cst_47 [2] : vector<2x8x8xf32> to vector<2x8xf32>
    %124 = vector.shape_cast %123 : vector<2x8xf32> to vector<2x8x1xf32>
    %125 = tpu.reciprocal %124 {approx = true} : vector<2x8x1xf32> -> vector<2x8x1xf32>
    %126 = vector.broadcast %125 : vector<2x8x1xf32> to vector<2x8x8xf32>
    %127 = arith.mulf %122, %126 : vector<2x8x8xf32>
    %128 = arith.truncf %127 : vector<2x8x8xf32> to vector<2x8x8xbf16>
    %129 = arith.truncf %112 : vector<2x8x8xf32> to vector<2x8x8xbf16>
    "tpu.trace_start"() <{level = 10 : i32, message = "bqk,bkd->bqd"}> : () -> ()
    %cst_48 = arith.constant dense<0.000000e+00> : vector<2x8x8xf32>
    %130 = tpu.matmul %128, %129, %cst_48 {dimension_numbers = #tpu.dot_dimension_numbers<[2], [1], [1], [2], [0, 0, 0, 1, 1, 2], [0], [0]>} : vector<2x8x8xbf16>, vector<2x8x8xbf16>, vector<2x8x8xf32> -> vector<2x8x8xf32>
    "tpu.trace_stop"() : () -> ()
    %c0_49 = arith.constant 0 : index
    %c0_50 = arith.constant 0 : index
    %131 = vector.load %arg10[%c0_49, %c0_50] : memref<16x32xf32, #tpu.memory_space<vmem>>, vector<16x32xf32>
    %132 = vector.shape_cast %130 : vector<2x8x8xf32> to vector<16x8xf32>
    %133 = arith.truncf %132 : vector<16x8xf32> to vector<16x8xbf16>
    %c16 = arith.constant 16 : index
    %c0_51 = arith.constant 0 : index
    %134 = vector.load %arg6[%c16, %c0_51] : memref<32x32xbf16, #tpu.memory_space<vmem>>, vector<8x32xbf16>
    %cst_52 = arith.constant dense<0.000000e+00> : vector<16x32xf32>
    %135 = tpu.matmul %133, %134, %cst_52 {dimension_numbers = #tpu.dot_dimension_numbers<[1], [0], [0], [1], [0, 0, 1, 1], [], []>} : vector<16x8xbf16>, vector<8x32xbf16>, vector<16x32xf32> -> vector<16x32xf32>
    %136 = arith.addf %131, %135 : vector<16x32xf32>
    %c0_53 = arith.constant 0 : index
    %c0_54 = arith.constant 0 : index
    %137 = vector.load %arg10[%c0_53, %c0_54] : memref<16x32xf32, #tpu.memory_space<vmem>>, vector<16x32xf32>
    tpu.vector_store %arg10[%c0_53, %c0_54], %136 {strides = array<i32>} : memref<16x32xf32, #tpu.memory_space<vmem>>, vector<16x32xf32>,
    %cst_55 = arith.constant dense<0.000000e+00> : vector<2x8xf32>
    %138 = vector.multi_reduction <add>, %127, %cst_55 [1] : vector<2x8x8xf32> to vector<2x8xf32>
    %139 = arith.addf %106, %138 : vector<2x8xf32>
    %140 = vector.extract_strided_slice %37 {offsets = [0, 24], sizes = [16, 8], strides = [1, 1]} : vector<16x96xf32> to vector<16x8xf32>
    %141 = vector.shape_cast %140 : vector<16x8xf32> to vector<2x8x8xf32>
    %142 = vector.extract_strided_slice %37 {offsets = [0, 56], sizes = [16, 8], strides = [1, 1]} : vector<16x96xf32> to vector<16x8xf32>
    %143 = vector.shape_cast %142 : vector<16x8xf32> to vector<2x8x8xf32>
    %144 = vector.extract_strided_slice %37 {offsets = [0, 88], sizes = [16, 8], strides = [1, 1]} : vector<16x96xf32> to vector<16x8xf32>
    %145 = vector.shape_cast %144 : vector<16x8xf32> to vector<2x8x8xf32>
    %146 = arith.truncf %141 : vector<2x8x8xf32> to vector<2x8x8xbf16>
    %147 = arith.truncf %143 : vector<2x8x8xf32> to vector<2x8x8xbf16>
    "tpu.trace_start"() <{level = 10 : i32, message = "bqd,bkd->bqk"}> : () -> ()
    %cst_56 = arith.constant dense<0.000000e+00> : vector<2x8x8xf32>
    %148 = tpu.matmul %146, %147, %cst_56 {dimension_numbers = #tpu.dot_dimension_numbers<[2], [2], [1], [1], [0, 0, 0, 1, 1, 1], [0], [0]>} : vector<2x8x8xbf16>, vector<2x8x8xbf16>, vector<2x8x8xf32> -> vector<2x8x8xf32>
    "tpu.trace_stop"() : () -> ()
    %cst_57 = arith.constant 0.353553385 : f32
    %149 = vector.broadcast %cst_57 : f32 to vector<2x8x8xf32>
    %150 = arith.mulf %148, %149 : vector<2x8x8xf32>
    %cst_58 = arith.constant dense<0xFF800000> : vector<2x8xf32>
    %151 = vector.multi_reduction <maximumf>, %150, %cst_58 [2] : vector<2x8x8xf32> to vector<2x8xf32>
    %152 = vector.shape_cast %151 : vector<2x8xf32> to vector<2x8x1xf32>
    %153 = vector.broadcast %152 : vector<2x8x1xf32> to vector<2x8x8xf32>
    %154 = arith.subf %150, %153 : vector<2x8x8xf32>
    %155 = math.exp %154 : vector<2x8x8xf32>
    %cst_59 = arith.constant dense<0.000000e+00> : vector<2x8xf32>
    %156 = vector.multi_reduction <add>, %155, %cst_59 [2] : vector<2x8x8xf32> to vector<2x8xf32>
    %157 = vector.shape_cast %156 : vector<2x8xf32> to vector<2x8x1xf32>
    %158 = tpu.reciprocal %157 {approx = true} : vector<2x8x1xf32> -> vector<2x8x1xf32>
    %159 = vector.broadcast %158 : vector<2x8x1xf32> to vector<2x8x8xf32>
    %160 = arith.mulf %155, %159 : vector<2x8x8xf32>
    %161 = arith.truncf %160 : vector<2x8x8xf32> to vector<2x8x8xbf16>
    %162 = arith.truncf %145 : vector<2x8x8xf32> to vector<2x8x8xbf16>
    "tpu.trace_start"() <{level = 10 : i32, message = "bqk,bkd->bqd"}> : () -> ()
    %cst_60 = arith.constant dense<0.000000e+00> : vector<2x8x8xf32>
    %163 = tpu.matmul %161, %162, %cst_60 {dimension_numbers = #tpu.dot_dimension_numbers<[2], [1], [1], [2], [0, 0, 0, 1, 1, 2], [0], [0]>} : vector<2x8x8xbf16>, vector<2x8x8xbf16>, vector<2x8x8xf32> -> vector<2x8x8xf32>
    "tpu.trace_stop"() : () -> ()
    %c0_61 = arith.constant 0 : index
    %c0_62 = arith.constant 0 : index
    %164 = vector.load %arg10[%c0_61, %c0_62] : memref<16x32xf32, #tpu.memory_space<vmem>>, vector<16x32xf32>
    %165 = vector.shape_cast %163 : vector<2x8x8xf32> to vector<16x8xf32>
    %166 = arith.truncf %165 : vector<16x8xf32> to vector<16x8xbf16>
    %c24 = arith.constant 24 : index
    %c0_63 = arith.constant 0 : index
    %167 = vector.load %arg6[%c24, %c0_63] : memref<32x32xbf16, #tpu.memory_space<vmem>>, vector<8x32xbf16>
    %cst_64 = arith.constant dense<0.000000e+00> : vector<16x32xf32>
    %168 = tpu.matmul %166, %167, %cst_64 {dimension_numbers = #tpu.dot_dimension_numbers<[1], [0], [0], [1], [0, 0, 1, 1], [], []>} : vector<16x8xbf16>, vector<8x32xbf16>, vector<16x32xf32> -> vector<16x32xf32>
    %169 = arith.addf %164, %168 : vector<16x32xf32>
    %c0_65 = arith.constant 0 : index
    %c0_66 = arith.constant 0 : index
    %170 = vector.load %arg10[%c0_65, %c0_66] : memref<16x32xf32, #tpu.memory_space<vmem>>, vector<16x32xf32>
    tpu.vector_store %arg10[%c0_65, %c0_66], %169 {strides = array<i32>} : memref<16x32xf32, #tpu.memory_space<vmem>>, vector<16x32xf32>,
    %cst_67 = arith.constant dense<0.000000e+00> : vector<2x8xf32>
    %171 = vector.multi_reduction <add>, %160, %cst_67 [1] : vector<2x8x8xf32> to vector<2x8xf32>
    %172 = arith.addf %139, %171 : vector<2x8xf32>
    %c0_68 = arith.constant 0 : index
    %c0_69 = arith.constant 0 : index
    %173 = vector.load %arg10[%c0_68, %c0_69] : memref<16x32xf32, #tpu.memory_space<vmem>>, vector<16x32xf32>
    %c0_70 = arith.constant 0 : index
    %c0_71 = arith.constant 0 : index
    %174 = vector.load %arg7[%c0_70, %c0_71] : memref<1x32xf32, #tpu.memory_space<vmem>>, vector<1x32xf32>
    %175 = vector.shape_cast %174 : vector<1x32xf32> to vector<32xf32>
    %176 = vector.shape_cast %175 : vector<32xf32> to vector<1x32xf32>
    %177 = vector.broadcast %176 : vector<1x32xf32> to vector<16x32xf32>
    %178 = arith.addf %173, %177 : vector<16x32xf32>
    %179 = vector.shape_cast %178 : vector<16x32xf32> to vector<2x8x32xf32>
    %c0_72 = arith.constant 0 : index
    %c0_73 = arith.constant 0 : index
    %c0_74 = arith.constant 0 : index
    %180 = vector.load %arg8[%c0_72, %c0_73, %c0_74] : memref<2x8x32xf32, #tpu.memory_space<vmem>>, vector<2x8x32xf32>
    tpu.vector_store %arg8[%c0_72, %c0_73, %c0_74], %179 {strides = array<i32>} : memref<2x8x32xf32, #tpu.memory_space<vmem>>, vector<2x8x32xf32>,
    %cst_75 = arith.constant 2.500000e-01 : f32
    %181 = vector.broadcast %cst_75 : f32 to vector<2x8xf32>
    %182 = arith.mulf %172, %181 : vector<2x8xf32>
    %c0_76 = arith.constant 0 : index
    %c0_77 = arith.constant 0 : index
    %c0_78 = arith.constant 0 : index
    %183 = vector.load %arg9[%c0_76, %c0_77, %c0_78] : memref<1x2x8xf32, #tpu.memory_space<vmem>>, vector<1x2x8xf32>
    %184 = vector.shape_cast %183 : vector<1x2x8xf32> to vector<2x8xf32>
    %185 = vector.shape_cast %182 : vector<2x8xf32> to vector<1x2x8xf32>
    tpu.vector_store %arg9[%c0_76, %c0_77, %c0_78], %185 {strides = array<i32>} : memref<1x2x8xf32, #tpu.memory_space<vmem>>, vector<1x2x8xf32>,
    return
  }
  func.func @transform_0(%arg0: i32) -> (i32, i32, i32) {
    %c0_i32 = arith.constant 0 : i32
    %c0_i32_0 = arith.constant 0 : i32
    %c0_i32_1 = arith.constant 0 : i32
    return %arg0, %c0_i32, %c0_i32_0 : i32, i32, i32
  }
  func.func @transform_1(%arg0: i32) -> (i32, i32) {
    %c0_i32 = arith.constant 0 : i32
    %c0_i32_0 = arith.constant 0 : i32
    %c0_i32_1 = arith.constant 0 : i32
    return %c0_i32, %c0_i32_0 : i32, i32
  }
  func.func @transform_2(%arg0: i32) -> (i32, i32) {
    %c0_i32 = arith.constant 0 : i32
    %c0_i32_0 = arith.constant 0 : i32
    %c0_i32_1 = arith.constant 0 : i32
    return %c0_i32, %c0_i32_0 : i32, i32
  }
  func.func @transform_3(%arg0: i32) -> (i32, i32) {
    %c0_i32 = arith.constant 0 : i32
    %c0_i32_0 = arith.constant 0 : i32
    %c0_i32_1 = arith.constant 0 : i32
    return %c0_i32, %c0_i32_0 : i32, i32
  }
  func.func @transform_4(%arg0: i32) -> (i32, i32) {
    %c0_i32 = arith.constant 0 : i32
    %c0_i32_0 = arith.constant 0 : i32
    %c0_i32_1 = arith.constant 0 : i32
    return %c0_i32, %c0_i32_0 : i32, i32
  }
  func.func @transform_5(%arg0: i32) -> (i32, i32) {
    %c0_i32 = arith.constant 0 : i32
    %c0_i32_0 = arith.constant 0 : i32
    %c0_i32_1 = arith.constant 0 : i32
    return %c0_i32, %c0_i32_0 : i32, i32
  }
  func.func @transform_6(%arg0: i32) -> (i32, i32) {
    %c0_i32 = arith.constant 0 : i32
    %c0_i32_0 = arith.constant 0 : i32
    %c0_i32_1 = arith.constant 0 : i32
    return %c0_i32, %c0_i32_0 : i32, i32
  }
  func.func @transform_7(%arg0: i32) -> (i32, i32, i32) {
    %c0_i32 = arith.constant 0 : i32
    %c0_i32_0 = arith.constant 0 : i32
    %c0_i32_1 = arith.constant 0 : i32
    return %arg0, %c0_i32, %c0_i32_0 : i32, i32, i32
  }
  func.func @transform_8(%arg0: i32) -> (i32, i32, i32) {
    %c0_i32 = arith.constant 0 : i32
    %c0_i32_0 = arith.constant 0 : i32
    %c0_i32_1 = arith.constant 0 : i32
    return %arg0, %c0_i32, %c0_i32_0 : i32, i32, i32
  }
}

</mosaic_0001>

<bundles_post_ra>
// kernel: tpu_custom_call.1
= control target key start
LH: loop header
LB: loop body
LE: loop exit
PB: predicated region body
PF: predicated region fallthrough
CT: control target
= control target key end

     0   :  { %14 = vsyncpa [#allocation4], 0  ;;  %s2149_s0 = inlined_call_operand.hbm [shape: f32[2,8,32], index: 0, kind: input, shape index: {}]   ;;  %s2150_s1 = inlined_call_operand.vmem [shape: f32[1,32], index: 1, kind: input, shape index: {}]   ;;  %s2151_s2 = inlined_call_operand.vmem [shape: f32[1,32], index: 2, kind: input, shape index: {}]   ;;  %s2152_s3 = inlined_call_operand.hbm [shape: bf16[32,96], index: 3, kind: input, shape index: {}]   ;;  %s2153_s4 = inlined_call_operand.hbm [shape: f32[1,96], index: 4, kind: input, shape index: {}]   ;;  %s2154_s5 = inlined_call_operand.vmem [shape: bf16[32,32], index: 5, kind: input, shape index: {}]   ;;  %s2155_s6 = inlined_call_operand.vmem [shape: f32[1,32], index: 6, kind: input, shape index: {}]   ;;  %s2156_s7 = inlined_call_operand.hbm [shape: f32[2,8,32], index: 7, kind: output, shape index: {0}]   ;;  %s2157_s8 = inlined_call_operand.hbm [shape: f32[1,2,8], index: 8, kind: output, shape index: {1}]  }
   0x1   :  { %15 = vsyncpa [#allocation7], 0 }
   0x2   :  { %16 = vsyncpa [#allocation5], 0 }
   0x3   :  { %17 = vsyncpa [#allocation11], 0  ;;  %s1791_s27 = smov [#allocation6]   ;;  %s1673_s9 = scalar_lea.hbm %s2152_s3, 256 }
   0x4   :  { %s39_s28 = sshll.u32 %s1791_s27, 4  ;;  %p1674_p0 = scmp.ne.s32.totalorder %s2152_s3, %s1673_s9  ;;  %s40_s28 = int_to_ptr.vmem [resolvable:$true] %s39_s28 }
   0x5   :  { %p1677_p1 = scmp.lt.u32.totalorder %s1673_s9, %s2152_s3 }
   0x7   :  { %p1679_p2 = pnand %p1677_p1, %p1674_p0 }
   0x9   :  { %1682 = shalt.err (!%p1679_p2)
}
   0xa   :  { %s1683_s14 = scalar_lea.vmem %s40_s28, 256  ;;  %p1688_p4 = scmp.lt.s32.totalorder %s40_s28, %s40_s28 }
   0xb   :  { %p1684_p3 = scmp.ne.s32.totalorder %s40_s28, %s1683_s14  ;;  %p1689_p5 = scmp.lt.s32.totalorder %s1683_s14, %s1683_s14 }
   0xd   :  { %p1690_p6 = por %p1689_p5, %p1688_p4 }
   0xf   :  { %p1691_p7 = pnand %p1690_p6, %p1684_p3 }
  0x11   :  { %1694 = shalt.err (!%p1691_p7)
}
  0x12   :  { %s1792_s15 = smov 64   ;;  %s1793_s16 = smov 4  }
  0x13   :  { %45 = dma.hbm_to_vmem [thread:$0]  %s2152_s3, 256, %s40_s28, [#allocation7], %s1792_s15, %s1792_s15, %s1793_s16  }
  0x14   :  { %s1794_s19 = smov [#allocation3]   ;;  %s1695_s23 = scalar_lea.hbm %s2149_s0, 256 }
  0x15   :  { %s23_s20 = sshll.u32 %s1794_s19, 4  ;;  %p1696_p8 = scmp.ne.s32.totalorder %s2149_s0, %s1695_s23  ;;  %s24_s20 = int_to_ptr.vmem [resolvable:$true] %s23_s20 }
  0x16   :  { %p1699_p9 = scmp.lt.u32.totalorder %s1695_s23, %s2149_s0 }
  0x18   :  { %p1701_p10 = pnand %p1699_p9, %p1696_p8 }
  0x1a   :  { %1704 = shalt.err (!%p1701_p10)
}
  0x1b   :  { %s1705_s29 = scalar_lea.vmem %s24_s20, 256  ;;  %p1710_p12 = scmp.lt.s32.totalorder %s24_s20, %s24_s20 }
  0x1c   :  { %p1706_p11 = scmp.ne.s32.totalorder %s24_s20, %s1705_s29  ;;  %p1711_p13 = scmp.lt.s32.totalorder %s1705_s29, %s1705_s29 }
  0x1e   :  { %p1712_p0 = por %p1711_p13, %p1710_p12 }
  0x20   :  { %p1713_p1 = pnand %p1712_p0, %p1706_p11 }
  0x22   :  { %1716 = shalt.err (!%p1713_p1)
}
  0x23   :  { %s1795_s3 = smov 128   ;;  %s1796_s28 = smov 8  }
  0x24   :  { %29 = dma.hbm_to_vmem [thread:$0]  %s2149_s0, 256, %s24_s20, [#allocation4], %s1795_s3, %s1795_s3, %s1796_s28  }
  0x25   :  { %s1797_s10 = smov [#allocation8]   ;;  %s1717_s14 = scalar_lea.hbm %s2153_s4, 16 }
  0x26   :  { %s52_s11 = sshll.u32 %s1797_s10, 4  ;;  %p1718_p2 = scmp.ne.s32.totalorder %s2153_s4, %s1717_s14  ;;  %s53_s11 = int_to_ptr.vmem [resolvable:$true] %s52_s11 }
  0x27   :  { %p1721_p3 = scmp.lt.u32.totalorder %s1717_s14, %s2153_s4 }
  0x29   :  { %p1723_p4 = pnand %p1721_p3, %p1718_p2 }
  0x2b   :  { %1726 = shalt.err (!%p1723_p4)
}
  0x2c   :  { %s1727_s21 = scalar_lea.vmem %s53_s11, 16  ;;  %s1731_s0 = scalar_lea.vmem %s53_s11, 32 }
  0x2d   :  { %p1728_p5 = scmp.ne.s32.totalorder %s53_s11, %s1727_s21  ;;  %p1732_p6 = scmp.lt.s32.totalorder %s53_s11, %s53_s11 }
  0x2e   :  { %p1733_p7 = scmp.lt.s32.totalorder %s1731_s0, %s1727_s21 }
  0x30   :  { %p1734_p8 = por %p1733_p7, %p1732_p6 }
  0x32   :  { %p1735_p9 = pnand %p1734_p8, %p1728_p5 }
  0x34   :  { %1738 = shalt.err (!%p1735_p9)
}
  0x35   :  { %55 = dma.hbm_to_vmem [thread:$0]  %s2153_s4, 16, %s53_s11, [#allocation7]  }
  0x36   :  { %1783 = dma.done.wait [#allocation4], 256  }
  0x37   :  { %1784 = vsyncadd [#allocation4], 4294967040 }
  0x38   :  { %1785 = dma.done.wait [#allocation7], 272  }
  0x39   :  { %1786 = vsyncadd [#allocation7], 4294967024  ;;  %vm72_vm0 = vcmask 261120   ;;  %v70_v0 = vld [vmem:[#allocation3] sm:$0xff]  ;;  %v71_v1 = vld [vmem:[#allocation3 + $0x8] sm:$0xff]  ;;  %v1798_v15 = vmov 0.0  }
  0x3a   :  { %v73_v2 = vsel %vm72_vm0, %v70_v0, 0.0  ;;  %v76_v3 = vsel %vm72_vm0, %v71_v1, 0.0  ;;  %v1635_v14 = vld [vmem:[#allocation6] sm:$0xff]   ;;  %1486 = vmatprep.subr.bf16.mxu0 %v1798_v15  ;;  %186 = vst.msk [vmem:[#allocation2] sm:$0xff] %vm72_vm0, %v1798_v15  ;;  %187 = vst.msk [vmem:[#allocation2 + $0x8] sm:$0xff] %vm72_vm0, %v1798_v15  ;;  %1494 = vmatprep.subr.bf16.mxu1 %v1798_v15  ;;  %v1636_v16 = vld [vmem:[#allocation6 + $0x8] sm:$0xff]  }
  0x3b   :  { %74 = vadd.xlane.f32.xlu0 %v73_v2  ;;  %1487 = vmatpush3.bf16.msra.mxu0 %v1635_v14  ;;  %vm1799_vm1 = vmmov 0   ;;  %v1416_v25 = vld [vmem:[%s2150_s1] ss:$0 sm:$0xff]  ;;  %v1418_v34 = vld [vmem:[#allocation8] ss:$0 sm:$0xff]  ;;  %s1800_s1 = smov 96  }
  0x3c   :  { %1490 = vmatprep.mubr.msk.bf16.mxu0 %vm1799_vm1, %v1798_v15  ;;  %1488 = vmatprep.subr.bf16.mxu0 %v1798_v15  ;;  %v1417_v29 = vld [vmem:[%s2151_s2] ss:$0 sm:$0xff]  ;;  %vm193_vm2 = vcmask 64512   ;;  %s1801_s2 = smov 88   ;;  %s1802_s26 = smov 120   ;;  %vm320_vm3 = vcmask 1043456  }
  0x3d   :  { %1496 = vmatprep.mubr.msk.bf16.mxu1 %vm1799_vm1, %v1798_v15  ;;  %s1803_s29 = smov 56   ;;  %s1804_s30 = smov 80   ;;  %vm1379_vm4 = vcmask 1041409   ;;  %vm1382_vm5 = vcmask 58368  }
  0x3e   :  { %s1805_s9 = smov 112   ;;  %s1806_s12 = smov 48  }
  0x3f   :  { %77 = vadd.xlane.f32.xlu0 %v76_v3  ;;  %1489 = vmatpush3.bf16.msra.mxu0 %v1636_v16  ;;  %s1807_s13 = smov 72   ;;  %s1808_s14 = smov 104  }
  0x40   :  { %1500 = vmatprep.subr.bf16.mxu0 %v1798_v15  ;;  %s1809_s18 = smov 40   ;;  %s1810_s0 = smov [#allocation10]  }
  0x41   :  { %s1402_s20 = sshll.u32 %s1810_s0, 4  ;;  %s1403_s20 = int_to_ptr.vmem [resolvable:$true] %s1402_s20 }
  0x42   :  { %s1739_s22 = scalar_lea.vmem %s1403_s20, 32  ;;  %p1744_p11 = scmp.lt.s32.totalorder %s1403_s20, %s1403_s20 }
  0x43   :  { %p1740_p10 = scmp.ne.s32.totalorder %s1403_s20, %s1739_s22  ;;  %p1745_p12 = scmp.lt.s32.totalorder %s1739_s22, %s1739_s22 }
  0x45   :  { %p1746_p13 = por %p1745_p12, %p1744_p11 }
  0x47   :  { %p1747_p0 = pnand %p1746_p13, %p1740_p10 }
  0xc8   :  { %v75_v4 = vpop.xlane.xlu0 %74 }
  0xc9   :  { %v80_v5 = vmul.f32 0.03125, %v75_v4 }
  0xcb   :  { %v82_v6 = vsub.f32 %v70_v0, %v80_v5 }
  0xcc   :  { %v78_v7 = vpop.xlane.xlu0 %77 }
  0xcd   :  { %v81_v8 = vmul.f32 0.03125, %v78_v7  ;;  %v84_v9 = vmul.f32 %v82_v6, %v82_v6 }
  0xcf   :  { %v83_v10 = vsub.f32 %v71_v1, %v81_v8  ;;  %v86_v11 = vsel %vm72_vm0, %v84_v9, 0.0 }
  0xd0   :  { %87 = vadd.xlane.f32.xlu1 %v86_v11 }
  0xd1   :  { %v85_v12 = vmul.f32 %v83_v10, %v83_v10 }
  0xd3   :  { %v89_v13 = vsel %vm72_vm0, %v85_v12, 0.0  ;;  %v415_v12 = vld [vmem:[%s2154_s5] sm:$0xf] }
  0xd4   :  { %90 = vadd.xlane.f32.xlu1 %v89_v13 }
 0x15d   :  { %v88_v17 = vpop.xlane.xlu1 %87 }
 0x15e   :  { %v92_v18 = vmul.f32 0.03125, %v88_v17 }
 0x160   :  { %v94_v19 = vadd.f32 1e-06, %v92_v18  ;;  %v420_v18 = vsel %vm320_vm3, %v415_v12, 0 }
 0x161   :  { %v91_v20 = vpop.xlane.xlu1 %90 }
 0x162   :  { %1637 = vrsqrt.f32 %v94_v19  ;;  %v93_v21 = vmul.f32 0.03125, %v91_v20 }
 0x164   :  { %v95_v22 = vadd.f32 1e-06, %v93_v21 }
 0x166   :  { %1639 = vrsqrt.f32 %v95_v22 }
 0x16c   :  { %v1638_v23 = vpop.eup %1637 }
 0x16d   :  { %v98_v24 = vmul.f32 %v1638_v23, %v82_v6 }
 0x16f   :  { %v107_v28 = vmul.f32 %v1416_v25, %v98_v24 }
 0x170   :  { %v1640_v26 = vpop.eup %1639 }
 0x171   :  { %v99_v27 = vmul.f32 %v1640_v26, %v83_v10  ;;  %v116_v31 = vadd.f32 %v1417_v29, %v107_v28 }
 0x173   :  { %v108_v30 = vmul.f32 %v1416_v25, %v99_v27 }
 0x175   :  { %v117_v32 = vadd.f32 %v1417_v29, %v108_v30 }
 0x177   :  { %v118_v33 = vpack.c.bf16 %v117_v32, %v116_v31 }
 0x179   :  { %1491 = vmatmul.mubr.msk.bf16.vlgmr.msra.gmra.mrb[0].mxu0 %vm72_vm0, %v118_v33 }
 0x17a   :  { %1502 = vmatprep.mubr.msk.bf16.mxu0 %vm1799_vm1, %v1798_v15 }
 0x24c   :  { %v179_v35 = vpop.f32.mrb[0].mxu0 }
 0x24d   :  { %v180_v36 = vadd.f32 %v1418_v34, %v179_v35  ;;  %v1492_v37 = vpop.f32.mrb[1].mxu0 }
 0x24e   :  { %v182_v38 = vpop.f32.mrb[2].mxu0 }
 0x24f   :  { %v1923_v39 = vpack.c.bf16 %v180_v36, %v180_v36  ;;  %v183_v40 = vadd.f32 %v1418_v34, %v182_v38  ;;  %v1493_v41 = vpop.f32.mrb[3].mxu0 }
 0x251   :  { %v1925_v42 = vpack.c.bf16 %v183_v40, %v183_v40  ;;  %191 = vrot.lane.b32.xlu0 %v1923_v39, %s1800_s1 }
 0x253   :  { %241 = vrot.lane.b32.xlu1 %v1925_v42, %s1800_s1 }
 0x2c3   :  { %v192_v43 = vpop.permute.xlu0 %191 }
 0x2c4   :  { %v198_v44 = vsel %vm193_vm2, %v192_v43, 0 }
 0x2c5   :  { %1495 = vmatpush3.bf16.xpose.msra.mxu1 %v198_v44  ;;  %v242_v45 = vpop.permute.xlu1 %241 }
 0x2c6   :  { %v247_v46 = vsel %vm193_vm2, %v242_v45, 0  ;;  %1506 = vmatprep.subr.bf16.mxu1 %v1798_v15 }
 0x2c7   :  { %1501 = vmatpush3.bf16.xpose.msra.mxu0 %v247_v46 }
 0x2c8   :  { %1512 = vmatprep.subr.bf16.mxu0 %v1798_v15 }
 0x2cc   :  { %1497 = vmatmul.mubr.msk.bf16.vlgmr.msra.gmra.mrb[0].mxu1 %vm193_vm2, %v1923_v39 }
 0x2cd   :  { %1508 = vmatprep.mubr.msk.bf16.mxu1 %vm1799_vm1, %v1798_v15 }
 0x2ce   :  { %1503 = vmatmul.mubr.msk.bf16.vlgmr.msra.gmra.mrb[4].mxu0 %vm193_vm2, %v1925_v42 }
 0x2cf   :  { %1514 = vmatprep.mubr.msk.bf16.mxu0 %vm1799_vm1, %v1798_v15 }
 0x39f   :  { %v234_v47 = vpop.f32.mrb[0].mxu1 }
 0x3a0   :  { %v289_v48 = vmul.f32 0.35355338, %v234_v47  ;;  %v1498_v49 = vpop.f32.mrb[1].mxu1 }
 0x3a1   :  { %v237_v50 = vpop.f32.mrb[2].mxu1  ;;  %v283_v51 = vpop.f32.mrb[4].mxu0 }
 0x3a2   :  { %v290_v52 = vmul.f32 0.35355338, %v283_v51  ;;  %v1499_v53 = vpop.f32.mrb[3].mxu1  ;;  %v1504_v54 = vpop.f32.mrb[5].mxu0  ;;  %v291_v55 = vsel %vm193_vm2, %v289_v48, -inf  ;;  %v413_v50 = vld [vmem:[#allocation2 + $0x8] sm:$0xff] }
 0x3a3   :  { %292 = vmax.xlane.f32.xlu1 %v291_v55  ;;  %v286_v56 = vpop.f32.mrb[6].mxu0 }
 0x3a4   :  { %v1505_v57 = vpop.f32.mrb[7].mxu0  ;;  %v294_v58 = vsel %vm193_vm2, %v290_v52, -inf }
 0x3a5   :  { %295 = vmax.xlane.f32.xlu0 %v294_v58 }
 0x430   :  { %v293_v59 = vpop.xlane.xlu1 %292 }
 0x431   :  { %v297_v60 = vsub.f32 %v289_v48, %v293_v59  ;;  %v412_v48 = vld [vmem:[#allocation2] sm:$0xff] }
 0x432   :  { %v296_v61 = vpop.xlane.xlu0 %295 }
 0x433   :  { %v299_v62 = vmul.f32 1.442695, %v297_v60  ;;  %v298_v63 = vsub.f32 %v290_v52, %v296_v61 }
 0x435   :  { %1641 = vpow2.f32 %v299_v62  ;;  %v301_v0 = vmul.f32 1.442695, %v298_v63 }
 0x437   :  { %1643 = vpow2.f32 %v301_v0 }
 0x43f   :  { %v1642_v1 = vpop.eup %1641 }
 0x440   :  { %v303_v2 = vsel %vm193_vm2, %v1642_v1, 0.0 }
 0x441   :  { %v1644_v3 = vpop.eup %1643  ;;  %304 = vadd.xlane.f32.xlu0 %v303_v2 }
 0x442   :  { %v306_v4 = vsel %vm193_vm2, %v1644_v3, 0.0 }
 0x443   :  { %307 = vadd.xlane.f32.xlu1 %v306_v4 }
 0x454   :  { %364 = vrot.lane.b32.xlu1 %v1925_v42, %s1792_s15 }
 0x457   :  { %315 = vrot.lane.b32.xlu0 %v1923_v39, %s1792_s15 }
 0x458   :  { %485 = vrot.lane.b32.xlu1 %v1923_v39, %s1801_s2 }
 0x45b   :  { %483 = vrot.lane.b32.xlu0 %v1923_v39, %s1802_s26 }
 0x45c   :  { %535 = vrot.lane.b32.xlu1 %v1925_v42, %s1801_s2 }
 0x460   :  { %533 = vrot.lane.b32.xlu1 %v1925_v42, %s1802_s26 }
 0x4ce   :  { %v305_v5 = vpop.xlane.xlu0 %304 }
 0x4cf   :  { %1645 = vrcp.f32 %v305_v5 }
 0x4d0   :  { %v308_v6 = vpop.xlane.xlu1 %307 }
 0x4d1   :  { %1647 = vrcp.f32 %v308_v6 }
 0x4d2   :  { %v316_v7 = vpop.permute.xlu0 %315 }
 0x4d3   :  { %v322_v8 = vsel %vm320_vm3, %v316_v7, 0 }
 0x4d4   :  { %v365_v9 = vpop.permute.xlu1 %364  ;;  %1507 = vmatpush3.bf16.msra.mxu1 %v322_v8 }
 0x4d5   :  { %v370_v10 = vsel %vm320_vm3, %v365_v9, 0  ;;  %1518 = vmatprep.subr.bf16.mxu1 %v1798_v15 }
 0x4d6   :  { %1513 = vmatpush3.bf16.msra.mxu0 %v370_v10  ;;  %v484_v22 = vpop.permute.xlu0 %483 }
 0x4d7   :  { %1524 = vmatprep.subr.bf16.mxu0 %v1798_v15 }
 0x4d8   :  { %v486_v19 = vpop.permute.xlu1 %485 }
 0x4d9   :  { %v1646_v11 = vpop.eup %1645  ;;  %v491_v21 = vsel %vm193_vm2, %v486_v19, 0 }
 0x4da   :  { %v1960_v13 = vmul.f32 %v1646_v11, %v1642_v1 }
 0x4db   :  { %v1648_v14 = vpop.eup %1647 }
 0x4dc   :  { %v1962_v16 = vmul.f32 %v1648_v14, %v1644_v3  ;;  %v313_v17 = vpack.c.bf16 %v1960_v13, %v1960_v13  ;;  %v536_v24 = vpop.permute.xlu1 %535  ;;  %v467_v63 = vsel %vm193_vm2, %v1960_v13, 0.0 }
 0x4dd   :  { %v541_v32 = vsel %vm193_vm2, %v536_v24, 0  ;;  %v468_v0 = vrot.slane %v467_v63, 4 }
 0x4de   :  { %1509 = vmatmul.mubr.msk.bf16.vlgmr.msra.gmra.mrb[4].mxu1 %vm193_vm2, %v313_v17  ;;  %v314_v20 = vpack.c.bf16 %v1962_v16, %v1962_v16 }
 0x4df   :  { %1519 = vmatpush3.bf16.msra.mxu1 %v420_v18  ;;  %1520 = vmatprep.mubr.msk.bf16.mxu1 %vm1799_vm1, %v1798_v15  ;;  %v469_v1 = vadd.f32 %v468_v0, %v467_v63 }
 0x4e0   :  { %1515 = vmatmul.mubr.msk.bf16.vlgmr.msra.gmra.mrb[8].mxu0 %vm193_vm2, %v314_v20  ;;  %1530 = vmatprep.subr.bf16.mxu1 %v1798_v15  ;;  %v534_v37 = vpop.permute.xlu1 %533 }
 0x4e1   :  { %1525 = vmatpush3.bf16.xpose.msra.mxu0 %v491_v21  ;;  %1526 = vmatprep.mubr.msk.bf16.mxu0 %vm1799_vm1, %v1798_v15  ;;  %v470_v4 = vrot.slane %v469_v1, 2 }
 0x4e2   :  { %1536 = vmatprep.subr.bf16.mxu0 %v1798_v15 }
 0x4e3   :  { %v471_v7 = vadd.f32 %v470_v4, %v469_v1 }
 0x4e5   :  { %v472_v11 = vrot.slane %v471_v7, 1 }
 0x4e7   :  { %v473_v14 = vadd.f32 %v472_v11, %v471_v7 }
 0x4e8   :  { %1527 = vmatmul.mubr.msk.bf16.vlgmr.msra.gmra.mrb[12].mxu0 %vm193_vm2, %v484_v22 }
 0x4e9   :  { %1538 = vmatprep.mubr.msk.bf16.mxu0 %vm1799_vm1, %v1798_v15 }
 0x5b1   :  { %v358_v23 = vpop.f32.mrb[4].mxu1 }
 0x5b2   :  { %v1510_v25 = vpop.f32.mrb[5].mxu1 }
 0x5b3   :  { %v361_v26 = vpop.f32.mrb[6].mxu1  ;;  %v406_v27 = vpop.f32.mrb[8].mxu0 }
 0x5b4   :  { %v414_v28 = vpack.c.bf16 %v406_v27, %v358_v23  ;;  %v1511_v29 = vpop.f32.mrb[7].mxu1  ;;  %v1516_v30 = vpop.f32.mrb[9].mxu0  ;;  %v474_v26 = vsel %vm193_vm2, %v1962_v16, 0.0 }
 0x5b5   :  { %v409_v31 = vpop.f32.mrb[10].mxu0 }
 0x5b6   :  { %v1517_v33 = vpop.f32.mrb[11].mxu0  ;;  %1521 = vmatmul.mubr.msk.bf16.vlgmr.msra.gmra.mrb[8].mxu1 %vm193_vm2, %v414_v28  ;;  %v475_v28 = vrot.slane %v474_v26, 4 }
 0x5b7   :  { %1531 = vmatpush3.bf16.xpose.msra.mxu1 %v541_v32  ;;  %1532 = vmatprep.mubr.msk.bf16.mxu1 %vm1799_vm1, %v1798_v15 }
 0x5b8   :  { %1542 = vmatprep.subr.bf16.mxu1 %v1798_v15  ;;  %v476_v31 = vadd.f32 %v475_v28, %v474_v26 }
 0x5bb   :  { %v527_v34 = vpop.f32.mrb[12].mxu0 }
 0x5bc   :  { %v583_v35 = vmul.f32 0.35355338, %v527_v34  ;;  %v1528_v36 = vpop.f32.mrb[13].mxu0  ;;  %v477_v34 = vrot.slane %v476_v31, 2 }
 0x5bd   :  { %v530_v38 = vpop.f32.mrb[14].mxu0 }
 0x5be   :  { %v1529_v40 = vpop.f32.mrb[15].mxu0  ;;  %1533 = vmatmul.mubr.msk.bf16.vlgmr.msra.gmra.mrb[12].mxu1 %vm193_vm2, %v534_v37  ;;  %v585_v41 = vsel %vm193_vm2, %v583_v35, -inf }
 0x5bf   :  { %586 = vmax.xlane.f32.xlu0 %v585_v41  ;;  %1544 = vmatprep.mubr.msk.bf16.mxu1 %vm1799_vm1, %v1798_v15  ;;  %v478_v40 = vadd.f32 %v477_v34, %v476_v31 }
 0x64c   :  { %v587_v43 = vpop.xlane.xlu0 %586 }
 0x64d   :  { %v591_v44 = vsub.f32 %v583_v35, %v587_v43 }
 0x64f   :  { %v593_v45 = vmul.f32 1.442695, %v591_v44 }
 0x651   :  { %1649 = vpow2.f32 %v593_v45  ;;  %v479_v45 = vrot.slane %v478_v40, 1 }
 0x65b   :  { %v1650_v46 = vpop.eup %1649 }
 0x65c   :  { %v597_v47 = vsel %vm193_vm2, %v1650_v46, 0.0 }
 0x65d   :  { %598 = vadd.xlane.f32.xlu0 %v597_v47 }
 0x689   :  { %v456_v49 = vpop.f32.mrb[8].mxu1 }
 0x68a   :  { %v463_v51 = vadd.f32 %v456_v49, %v412_v48  ;;  %v1522_v52 = vpop.f32.mrb[9].mxu1  ;;  %v480_v48 = vadd.f32 %v479_v45, %v478_v40 }
 0x68b   :  { %v459_v53 = vpop.f32.mrb[10].mxu1 }
 0x68c   :  { %465 = vst.msk [vmem:[#allocation2] sm:$0xff] %vm72_vm0, %v463_v51  ;;  %v464_v54 = vadd.f32 %v459_v53, %v413_v50  ;;  %v1523_v55 = vpop.f32.mrb[11].mxu1  ;;  %v708_v51 = vld [vmem:[%s2154_s5 + $0x4] sm:$0xf] }
 0x68d   :  { %v713_v52 = vsel %vm320_vm3, %v708_v51, 0 }
 0x68e   :  { %466 = vst.msk [vmem:[#allocation2 + $0x8] sm:$0xff] %vm72_vm0, %v464_v54 }
 0x691   :  { %v577_v56 = vpop.f32.mrb[12].mxu1 }
 0x692   :  { %v584_v57 = vmul.f32 0.35355338, %v577_v56  ;;  %v1534_v58 = vpop.f32.mrb[13].mxu1 }
 0x693   :  { %v580_v59 = vpop.f32.mrb[14].mxu1 }
 0x694   :  { %v1535_v60 = vpop.f32.mrb[15].mxu1  ;;  %v588_v61 = vsel %vm193_vm2, %v584_v57, -inf }
 0x695   :  { %589 = vmax.xlane.f32.xlu1 %v588_v61 }
 0x6a6   :  { %657 = vrot.lane.b32.xlu1 %v1925_v42, %s1803_s29 }
 0x6aa   :  { %778 = vrot.lane.b32.xlu1 %v1923_v39, %s1804_s30 }
 0x6ae   :  { %828 = vrot.lane.b32.xlu1 %v1925_v42, %s1804_s30 }
 0x6b2   :  { %826 = vrot.lane.b32.xlu1 %v1925_v42, %s1805_s9 }
 0x6ea   :  { %v599_v62 = vpop.xlane.xlu0 %598 }
 0x6eb   :  { %1651 = vrcp.f32 %v599_v62 }
 0x6f5   :  { %v1652_v2 = vpop.eup %1651 }
 0x6f6   :  { %v605_v3 = vmul.f32 %v1652_v2, %v1650_v46 }
 0x6f8   :  { %v760_v5 = vsel %vm193_vm2, %v605_v3, 0.0  ;;  %v607_v30 = vpack.c.bf16 %v605_v3, %v605_v3 }
 0x6f9   :  { %v761_v6 = vrot.slane %v760_v5, 4 }
 0x6fb   :  { %v762_v8 = vadd.f32 %v761_v6, %v760_v5 }
 0x6fd   :  { %v763_v9 = vrot.slane %v762_v8, 2 }
 0x6ff   :  { %v764_v10 = vadd.f32 %v763_v9, %v762_v8 }
 0x701   :  { %v765_v12 = vrot.slane %v764_v10, 1 }
 0x703   :  { %v766_v17 = vadd.f32 %v765_v12, %v764_v10  ;;  %v705_v12 = vld [vmem:[#allocation2] sm:$0xff] }
 0x705   :  { %v2003_v18 = vadd.f32 %v766_v17, %v473_v14 }
 0x722   :  { %v590_v19 = vpop.xlane.xlu1 %589 }
 0x723   :  { %v592_v13 = vsub.f32 %v584_v57, %v590_v19 }
 0x725   :  { %v595_v20 = vmul.f32 1.442695, %v592_v13  ;;  %v706_v13 = vld [vmem:[#allocation2 + $0x8] sm:$0xff] }
 0x726   :  { %v658_v21 = vpop.permute.xlu1 %657 }
 0x727   :  { %1653 = vpow2.f32 %v595_v20  ;;  %v663_v22 = vsel %vm320_vm3, %v658_v21, 0 }
 0x728   :  { %1543 = vmatpush3.bf16.msra.mxu1 %v663_v22 }
 0x729   :  { %1554 = vmatprep.subr.bf16.mxu1 %v1798_v15 }
 0x72a   :  { %v779_v35 = vpop.permute.xlu1 %778 }
 0x72b   :  { %v784_v38 = vsel %vm193_vm2, %v779_v35, 0 }
 0x72e   :  { %v829_v57 = vpop.permute.xlu1 %828 }
 0x72f   :  { %v834_v62 = vsel %vm193_vm2, %v829_v57, 0 }
 0x731   :  { %v1654_v23 = vpop.eup %1653 }
 0x732   :  { %v600_v24 = vsel %vm193_vm2, %v1654_v23, 0.0  ;;  %v827_v3 = vpop.permute.xlu1 %826 }
 0x733   :  { %601 = vadd.xlane.f32.xlu0 %v600_v24 }
 0x749   :  { %609 = vrot.lane.b32.xlu0 %v1923_v39, %s1803_s29 }
 0x74d   :  { %776 = vrot.lane.b32.xlu0 %v1923_v39, %s1805_s9 }
 0x7c0   :  { %v602_v25 = vpop.xlane.xlu0 %601 }
 0x7c1   :  { %1655 = vrcp.f32 %v602_v25 }
 0x7c4   :  { %v610_v27 = vpop.permute.xlu0 %609 }
 0x7c5   :  { %v615_v29 = vsel %vm320_vm3, %v610_v27, 0 }
 0x7c6   :  { %1537 = vmatpush3.bf16.msra.mxu0 %v615_v29 }
 0x7c7   :  { %1548 = vmatprep.subr.bf16.mxu0 %v1798_v15 }
 0x7c8   :  { %v777_v46 = vpop.permute.xlu0 %776 }
 0x7c9   :  { %1539 = vmatmul.mubr.msk.bf16.vlgmr.msra.gmra.mrb[16].mxu0 %vm193_vm2, %v607_v30 }
 0x7ca   :  { %1550 = vmatprep.mubr.msk.bf16.mxu0 %vm1799_vm1, %v1798_v15  ;;  %1549 = vmatpush3.bf16.msra.mxu0 %v713_v52 }
 0x7cb   :  { %v1656_v32 = vpop.eup %1655  ;;  %1560 = vmatprep.subr.bf16.mxu0 %v1798_v15 }
 0x7cc   :  { %v606_v33 = vmul.f32 %v1656_v32, %v1654_v23 }
 0x7ce   :  { %v767_v16 = vsel %vm193_vm2, %v606_v33, 0.0  ;;  %v608_v36 = vpack.c.bf16 %v606_v33, %v606_v33 }
 0x7cf   :  { %v768_v37 = vrot.slane %v767_v16, 4 }
 0x7d0   :  { %1545 = vmatmul.mubr.msk.bf16.vlgmr.msra.gmra.mrb[16].mxu1 %vm193_vm2, %v608_v36 }
 0x7d1   :  { %v769_v41 = vadd.f32 %v768_v37, %v767_v16  ;;  %1555 = vmatpush3.bf16.xpose.msra.mxu1 %v784_v38  ;;  %1556 = vmatprep.mubr.msk.bf16.mxu1 %vm1799_vm1, %v1798_v15 }
 0x7d2   :  { %1566 = vmatprep.subr.bf16.mxu1 %v1798_v15 }
 0x7d3   :  { %v770_v43 = vrot.slane %v769_v41, 2 }
 0x7d5   :  { %v771_v44 = vadd.f32 %v770_v43, %v769_v41 }
 0x7d7   :  { %v772_v47 = vrot.slane %v771_v44, 1 }
 0x7d8   :  { %1557 = vmatmul.mubr.msk.bf16.vlgmr.msra.gmra.mrb[20].mxu1 %vm193_vm2, %v777_v46 }
 0x7d9   :  { %1568 = vmatprep.mubr.msk.bf16.mxu1 %vm1799_vm1, %v1798_v15  ;;  %v773_v49 = vadd.f32 %v772_v47, %v771_v44 }
 0x7db   :  { %v2028_v50 = vadd.f32 %v773_v49, %v480_v48 }
 0x89c   :  { %v651_v53 = vpop.f32.mrb[16].mxu0 }
 0x89d   :  { %v1540_v54 = vpop.f32.mrb[17].mxu0 }
 0x89e   :  { %v654_v55 = vpop.f32.mrb[18].mxu0 }
 0x89f   :  { %v1541_v56 = vpop.f32.mrb[19].mxu0 }
 0x8a3   :  { %v699_v58 = vpop.f32.mrb[16].mxu1 }
 0x8a4   :  { %v707_v59 = vpack.c.bf16 %v699_v58, %v651_v53  ;;  %v1546_v60 = vpop.f32.mrb[17].mxu1 }
 0x8a5   :  { %v702_v61 = vpop.f32.mrb[18].mxu1 }
 0x8a6   :  { %v1547_v63 = vpop.f32.mrb[19].mxu1  ;;  %1551 = vmatmul.mubr.msk.bf16.vlgmr.msra.gmra.mrb[20].mxu0 %vm193_vm2, %v707_v59 }
 0x8a7   :  { %1561 = vmatpush3.bf16.xpose.msra.mxu0 %v834_v62  ;;  %1562 = vmatprep.mubr.msk.bf16.mxu0 %vm1799_vm1, %v1798_v15 }
 0x8a8   :  { %1572 = vmatprep.subr.bf16.mxu0 %v1798_v15 }
 0x8ab   :  { %v820_v0 = vpop.f32.mrb[20].mxu1 }
 0x8ac   :  { %v876_v1 = vmul.f32 0.35355338, %v820_v0  ;;  %v1558_v2 = vpop.f32.mrb[21].mxu1 }
 0x8ad   :  { %v823_v4 = vpop.f32.mrb[22].mxu1  ;;  %v1001_v2 = vld [vmem:[%s2154_s5 + $0x8] sm:$0xf] }
 0x8ae   :  { %v1559_v5 = vpop.f32.mrb[23].mxu1  ;;  %1563 = vmatmul.mubr.msk.bf16.vlgmr.msra.gmra.mrb[24].mxu0 %vm193_vm2, %v827_v3  ;;  %v878_v6 = vsel %vm193_vm2, %v876_v1, -inf  ;;  %v1006_v3 = vsel %vm320_vm3, %v1001_v2, 0 }
 0x8af   :  { %879 = vmax.xlane.f32.xlu0 %v878_v6  ;;  %1574 = vmatprep.mubr.msk.bf16.mxu0 %vm1799_vm1, %v1798_v15 }
 0x93c   :  { %v880_v7 = vpop.xlane.xlu0 %879 }
 0x93d   :  { %v884_v8 = vsub.f32 %v876_v1, %v880_v7 }
 0x93f   :  { %v886_v9 = vmul.f32 1.442695, %v884_v8 }
 0x941   :  { %1657 = vpow2.f32 %v886_v9 }
 0x94b   :  { %v1658_v10 = vpop.eup %1657 }
 0x94c   :  { %v890_v11 = vsel %vm193_vm2, %v1658_v10, 0.0 }
 0x94d   :  { %891 = vadd.xlane.f32.xlu0 %v890_v11 }
 0x979   :  { %v749_v14 = vpop.f32.mrb[20].mxu0 }
 0x97a   :  { %v756_v17 = vadd.f32 %v749_v14, %v705_v12  ;;  %v1552_v19 = vpop.f32.mrb[21].mxu0 }
 0x97b   :  { %v752_v20 = vpop.f32.mrb[22].mxu0 }
 0x97c   :  { %758 = vst.msk [vmem:[#allocation2] sm:$0xff] %vm72_vm0, %v756_v17  ;;  %v757_v21 = vadd.f32 %v752_v20, %v706_v13  ;;  %v1553_v22 = vpop.f32.mrb[23].mxu0 }
 0x97e   :  { %759 = vst.msk [vmem:[#allocation2 + $0x8] sm:$0xff] %vm72_vm0, %v757_v21 }
 0x981   :  { %v870_v23 = vpop.f32.mrb[24].mxu0 }
 0x982   :  { %v877_v24 = vmul.f32 0.35355338, %v870_v23  ;;  %v1564_v25 = vpop.f32.mrb[25].mxu0 }
 0x983   :  { %v873_v26 = vpop.f32.mrb[26].mxu0 }
 0x984   :  { %v1565_v27 = vpop.f32.mrb[27].mxu0  ;;  %v881_v28 = vsel %vm193_vm2, %v877_v24, -inf }
 0x985   :  { %882 = vmax.xlane.f32.xlu1 %v881_v28 }
 0x996   :  { %950 = vrot.lane.b32.xlu1 %v1925_v42, %s1806_s12 }
 0x99a   :  { %1071 = vrot.lane.b32.xlu1 %v1923_v39, %s1807_s13 }
 0x99e   :  { %1121 = vrot.lane.b32.xlu1 %v1925_v42, %s1807_s13 }
 0x9a2   :  { %1119 = vrot.lane.b32.xlu1 %v1925_v42, %s1808_s14 }
 0x9da   :  { %v892_v29 = vpop.xlane.xlu0 %891 }
 0x9db   :  { %1659 = vrcp.f32 %v892_v29  ;;  %v998_v29 = vld [vmem:[#allocation2] sm:$0xff] }
 0x9e5   :  { %v1660_v30 = vpop.eup %1659 }
 0x9e6   :  { %v898_v31 = vmul.f32 %v1660_v30, %v1658_v10 }
 0x9e8   :  { %v1053_v32 = vsel %vm193_vm2, %v898_v31, 0.0  ;;  %v900_v51 = vpack.c.bf16 %v898_v31, %v898_v31 }
 0x9e9   :  { %v1054_v33 = vrot.slane %v1053_v32, 4 }
 0x9eb   :  { %v1055_v34 = vadd.f32 %v1054_v33, %v1053_v32  ;;  %v999_v33 = vld [vmem:[#allocation2 + $0x8] sm:$0xff] }
 0x9ed   :  { %v1056_v35 = vrot.slane %v1055_v34, 2 }
 0x9ef   :  { %v1057_v16 = vadd.f32 %v1056_v35, %v1055_v34 }
 0x9f1   :  { %v1058_v36 = vrot.slane %v1057_v16, 1 }
 0x9f3   :  { %v1059_v37 = vadd.f32 %v1058_v36, %v1057_v16 }
 0x9f5   :  { %v2054_v38 = vadd.f32 %v1059_v37, %v2003_v18 }
 0xa12   :  { %v883_v40 = vpop.xlane.xlu1 %882 }
 0xa13   :  { %v885_v41 = vsub.f32 %v877_v24, %v883_v40 }
 0xa15   :  { %v888_v43 = vmul.f32 1.442695, %v885_v41 }
 0xa16   :  { %v951_v44 = vpop.permute.xlu1 %950 }
 0xa17   :  { %1661 = vpow2.f32 %v888_v43  ;;  %v956_v45 = vsel %vm320_vm3, %v951_v44, 0 }
 0xa18   :  { %1573 = vmatpush3.bf16.msra.mxu0 %v956_v45 }
 0xa19   :  { %1584 = vmatprep.subr.bf16.mxu0 %v1798_v15 }
 0xa1a   :  { %v1072_v54 = vpop.permute.xlu1 %1071 }
 0xa1b   :  { %v1077_v58 = vsel %vm193_vm2, %v1072_v54, 0 }
 0xa1e   :  { %v1122_v8 = vpop.permute.xlu1 %1121 }
 0xa21   :  { %v1662_v46 = vpop.eup %1661 }
 0xa22   :  { %v893_v47 = vsel %vm193_vm2, %v1662_v46, 0.0  ;;  %v1120_v20 = vpop.permute.xlu1 %1119 }
 0xa23   :  { %894 = vadd.xlane.f32.xlu0 %v893_v47 }
 0xa39   :  { %902 = vrot.lane.b32.xlu0 %v1923_v39, %s1806_s12 }
 0xa3d   :  { %1069 = vrot.lane.b32.xlu0 %v1923_v39, %s1808_s14 }
 0xab0   :  { %v895_v18 = vpop.xlane.xlu0 %894 }
 0xab1   :  { %1663 = vrcp.f32 %v895_v18 }
 0xab4   :  { %v903_v48 = vpop.permute.xlu0 %902 }
 0xab5   :  { %v908_v49 = vsel %vm320_vm3, %v903_v48, 0 }
 0xab6   :  { %1567 = vmatpush3.bf16.msra.mxu1 %v908_v49 }
 0xab7   :  { %1578 = vmatprep.subr.bf16.mxu1 %v1798_v15 }
 0xab8   :  { %v1070_v62 = vpop.permute.xlu0 %1069 }
 0xab9   :  { %1569 = vmatmul.mubr.msk.bf16.vlgmr.msra.gmra.mrb[24].mxu1 %vm193_vm2, %v900_v51 }
 0xaba   :  { %1580 = vmatprep.mubr.msk.bf16.mxu1 %vm1799_vm1, %v1798_v15  ;;  %1579 = vmatpush3.bf16.msra.mxu1 %v1006_v3 }
 0xabb   :  { %v1664_v52 = vpop.eup %1663  ;;  %1590 = vmatprep.subr.bf16.mxu1 %v1798_v15 }
 0xabc   :  { %v899_v53 = vmul.f32 %v1664_v52, %v1662_v46 }
 0xabe   :  { %v1060_v55 = vsel %vm193_vm2, %v899_v53, 0.0  ;;  %v901_v56 = vpack.c.bf16 %v899_v53, %v899_v53 }
 0xabf   :  { %v1061_v57 = vrot.slane %v1060_v55, 4 }
 0xac0   :  { %1575 = vmatmul.mubr.msk.bf16.vlgmr.msra.gmra.mrb[28].mxu0 %vm193_vm2, %v901_v56 }
 0xac1   :  { %v1062_v59 = vadd.f32 %v1061_v57, %v1060_v55  ;;  %1585 = vmatpush3.bf16.xpose.msra.mxu0 %v1077_v58  ;;  %1586 = vmatprep.mubr.msk.bf16.mxu0 %vm1799_vm1, %v1798_v15 }
 0xac2   :  { %1596 = vmatprep.subr.bf16.mxu0 %v1798_v15 }
 0xac3   :  { %v1063_v60 = vrot.slane %v1062_v59, 2 }
 0xac5   :  { %v1064_v61 = vadd.f32 %v1063_v60, %v1062_v59 }
 0xac7   :  { %v1065_v63 = vrot.slane %v1064_v61, 1 }
 0xac8   :  { %1587 = vmatmul.mubr.msk.bf16.vlgmr.msra.gmra.mrb[32].mxu0 %vm193_vm2, %v1070_v62 }
 0xac9   :  { %1598 = vmatprep.mubr.msk.bf16.mxu0 %vm1799_vm1, %v1798_v15  ;;  %v1066_v0 = vadd.f32 %v1065_v63, %v1064_v61 }
 0xacb   :  { %v2076_v1 = vadd.f32 %v1066_v0, %v2028_v50  ;;  %v1127_v50 = vsel %vm193_vm2, %v1122_v8, 0 }
 0xb8c   :  { %v944_v4 = vpop.f32.mrb[24].mxu1 }
 0xb8d   :  { %v1570_v5 = vpop.f32.mrb[25].mxu1 }
 0xb8e   :  { %v947_v6 = vpop.f32.mrb[26].mxu1 }
 0xb8f   :  { %v1571_v7 = vpop.f32.mrb[27].mxu1 }
 0xb93   :  { %v992_v9 = vpop.f32.mrb[28].mxu0 }
 0xb94   :  { %v1000_v10 = vpack.c.bf16 %v992_v9, %v944_v4  ;;  %v1576_v11 = vpop.f32.mrb[29].mxu0 }
 0xb95   :  { %v995_v12 = vpop.f32.mrb[30].mxu0 }
 0xb96   :  { %v1577_v14 = vpop.f32.mrb[31].mxu0  ;;  %1581 = vmatmul.mubr.msk.bf16.vlgmr.msra.gmra.mrb[28].mxu1 %vm193_vm2, %v1000_v10 }
 0xb97   :  { %1591 = vmatpush3.bf16.xpose.msra.mxu1 %v1127_v50  ;;  %1592 = vmatprep.mubr.msk.bf16.mxu1 %vm1799_vm1, %v1798_v15 }
 0xb98   :  { %1602 = vmatprep.subr.bf16.mxu1 %v1798_v15 }
 0xb9b   :  { %v1113_v17 = vpop.f32.mrb[32].mxu0 }
 0xb9c   :  { %v1169_v19 = vmul.f32 0.35355338, %v1113_v17  ;;  %v1588_v13 = vpop.f32.mrb[33].mxu0  ;;  %v1294_v17 = vld [vmem:[%s2154_s5 + $0xc] sm:$0xf] }
 0xb9d   :  { %v1116_v21 = vpop.f32.mrb[34].mxu0 }
 0xb9e   :  { %v1589_v22 = vpop.f32.mrb[35].mxu0  ;;  %1593 = vmatmul.mubr.msk.bf16.vlgmr.msra.gmra.mrb[32].mxu1 %vm193_vm2, %v1120_v20  ;;  %v1171_v23 = vsel %vm193_vm2, %v1169_v19, -inf }
 0xb9f   :  { %1172 = vmax.xlane.f32.xlu0 %v1171_v23  ;;  %1604 = vmatprep.mubr.msk.bf16.mxu1 %vm1799_vm1, %v1798_v15 }
 0xc2c   :  { %v1173_v24 = vpop.xlane.xlu0 %1172 }
 0xc2d   :  { %v1177_v25 = vsub.f32 %v1169_v19, %v1173_v24  ;;  %v1299_v19 = vsel %vm320_vm3, %v1294_v17, 0 }
 0xc2f   :  { %v1179_v26 = vmul.f32 1.442695, %v1177_v25 }
 0xc31   :  { %1665 = vpow2.f32 %v1179_v26 }
 0xc3b   :  { %v1666_v27 = vpop.eup %1665 }
 0xc3c   :  { %v1183_v28 = vsel %vm193_vm2, %v1666_v27, 0.0 }
 0xc3d   :  { %1184 = vadd.xlane.f32.xlu0 %v1183_v28 }
 0xc69   :  { %v1042_v30 = vpop.f32.mrb[28].mxu1 }
 0xc6a   :  { %v1049_v31 = vadd.f32 %v1042_v30, %v998_v29  ;;  %v1582_v32 = vpop.f32.mrb[29].mxu1 }
 0xc6b   :  { %v1045_v34 = vpop.f32.mrb[30].mxu1 }
 0xc6c   :  { %1051 = vst.msk [vmem:[#allocation2] sm:$0xff] %vm72_vm0, %v1049_v31  ;;  %v1050_v35 = vadd.f32 %v1045_v34, %v999_v33  ;;  %v1583_v16 = vpop.f32.mrb[31].mxu1 }
 0xc6e   :  { %1052 = vst.msk [vmem:[#allocation2 + $0x8] sm:$0xff] %vm72_vm0, %v1050_v35 }
 0xc71   :  { %v1163_v36 = vpop.f32.mrb[32].mxu1 }
 0xc72   :  { %v1170_v37 = vmul.f32 0.35355338, %v1163_v36  ;;  %v1594_v40 = vpop.f32.mrb[33].mxu1 }
 0xc73   :  { %v1166_v41 = vpop.f32.mrb[34].mxu1 }
 0xc74   :  { %v1595_v43 = vpop.f32.mrb[35].mxu1  ;;  %v1174_v44 = vsel %vm193_vm2, %v1170_v37, -inf }
 0xc75   :  { %1175 = vmax.xlane.f32.xlu1 %v1174_v44 }
 0xc86   :  { %1243 = vrot.lane.b32.xlu1 %v1925_v42, %s1809_s18 }
 0xcca   :  { %v1185_v52 = vpop.xlane.xlu0 %1184 }
 0xd02   :  { %v1176_v45 = vpop.xlane.xlu1 %1175 }
 0xd03   :  { %v1178_v46 = vsub.f32 %v1170_v37, %v1176_v45 }
 0xd05   :  { %v1181_v47 = vmul.f32 1.442695, %v1178_v46 }
 0xd06   :  { %v1244_v18 = vpop.permute.xlu1 %1243 }
 0xd07   :  { %1667 = vpow2.f32 %v1181_v47  ;;  %v1249_v48 = vsel %vm320_vm3, %v1244_v18, 0 }
 0xd08   :  { %1603 = vmatpush3.bf16.msra.mxu1 %v1249_v48  ;;  %1669 = vrcp.f32 %v1185_v52 }
 0xd11   :  { %v1668_v49 = vpop.eup %1667 }
 0xd12   :  { %v1186_v51 = vsel %vm193_vm2, %v1668_v49, 0.0  ;;  %v1670_v53 = vpop.eup %1669 }
 0xd13   :  { %1187 = vadd.xlane.f32.xlu0 %v1186_v51  ;;  %v1191_v54 = vmul.f32 %v1670_v53, %v1666_v27 }
 0xd15   :  { %v1346_v42 = vsel %vm193_vm2, %v1191_v54, 0.0  ;;  %v1193_v60 = vpack.c.bf16 %v1191_v54, %v1191_v54 }
 0xd16   :  { %v1347_v56 = vrot.slane %v1346_v42, 4 }
 0xd18   :  { %v1348_v58 = vadd.f32 %v1347_v56, %v1346_v42 }
 0xd29   :  { %1195 = vrot.lane.b32.xlu0 %v1923_v39, %s1809_s18  ;;  %v1349_v39 = vrot.slane %v1348_v58, 2 }
 0xd2b   :  { %v1350_v63 = vadd.f32 %v1349_v39, %v1348_v58 }
 0xd2d   :  { %v1351_v5 = vrot.slane %v1350_v63, 1 }
 0xd2f   :  { %v1352_v7 = vadd.f32 %v1351_v5, %v1350_v63 }
 0xd31   :  { %v1360_v11 = vadd.f32 %v1352_v7, %v2054_v38 }
 0xd33   :  { %v1375_v12 = vmul.f32 0.25, %v1360_v11 }
 0xda0   :  { %v1188_v55 = vpop.xlane.xlu0 %1187 }
 0xda1   :  { %1671 = vrcp.f32 %v1188_v55 }
 0xda4   :  { %v1196_v57 = vpop.permute.xlu0 %1195 }
 0xda5   :  { %v1201_v59 = vsel %vm320_vm3, %v1196_v57, 0 }
 0xda6   :  { %1597 = vmatpush3.bf16.msra.mxu0 %v1201_v59 }
 0xda7   :  { %1608 = vmatprep.subr.bf16.mxu0 %v1798_v15 }
 0xda9   :  { %1599 = vmatmul.mubr.msk.bf16.vlgmr.msra.gmra.mrb[36].mxu0 %vm193_vm2, %v1193_v60 }
 0xdaa   :  { %1610 = vmatprep.mubr.msk.bf16.mxu0 %vm1799_vm1, %v1798_v15  ;;  %1609 = vmatpush3.bf16.msra.mxu0 %v1299_v19 }
 0xdab   :  { %v1672_v61 = vpop.eup %1671 }
 0xdac   :  { %v1192_v62 = vmul.f32 %v1672_v61, %v1668_v49 }
 0xdae   :  { %v1353_v0 = vsel %vm193_vm2, %v1192_v62, 0.0  ;;  %v1194_v2 = vpack.c.bf16 %v1192_v62, %v1192_v62 }
 0xdaf   :  { %v1354_v3 = vrot.slane %v1353_v0, 4 }
 0xdb0   :  { %1605 = vmatmul.mubr.msk.bf16.vlgmr.msra.gmra.mrb[36].mxu1 %vm193_vm2, %v1194_v2 }
 0xdb1   :  { %v1355_v4 = vadd.f32 %v1354_v3, %v1353_v0 }
 0xdb3   :  { %v1356_v6 = vrot.slane %v1355_v4, 2 }
 0xdb5   :  { %v1357_v8 = vadd.f32 %v1356_v6, %v1355_v4 }
 0xdb7   :  { %v1358_v9 = vrot.slane %v1357_v8, 1 }
 0xdb9   :  { %v1359_v10 = vadd.f32 %v1358_v9, %v1357_v8 }
 0xdbb   :  { %v1361_v15 = vadd.f32 %v1359_v10, %v2076_v1 }
 0xdbd   :  { %v1376_v50 = vmul.f32 0.25, %v1361_v15 }
 0xdbf   :  { %v1380_v14 = vsel %vm1379_vm4, %v1376_v50, %v1375_v12 }
 0xdc0   :  { %1383 = vst.msk [vmem:[#allocation10] sm:$0x3] %vm1382_vm5, %v1380_v14 }
 0xe7c   :  { %v1237_v13 = vpop.f32.mrb[36].mxu0 }
 0xe7d   :  { %v1600_v20 = vpop.f32.mrb[37].mxu0 }
 0xe7e   :  { %v1240_v21 = vpop.f32.mrb[38].mxu0 }
 0xe7f   :  { %v1601_v22 = vpop.f32.mrb[39].mxu0 }
 0xe83   :  { %v1285_v38 = vpop.f32.mrb[36].mxu1 }
 0xe84   :  { %v1293_v23 = vpack.c.bf16 %v1285_v38, %v1237_v13  ;;  %v1606_v1 = vpop.f32.mrb[37].mxu1 }
 0xe85   :  { %v1288_v24 = vpop.f32.mrb[38].mxu1 }
 0xe86   :  { %v1607_v25 = vpop.f32.mrb[39].mxu1  ;;  %1611 = vmatmul.mubr.msk.bf16.vlgmr.msra.gmra.mrb[40].mxu0 %vm193_vm2, %v1293_v23 }
 0xe87   :  { %1750 = shalt.err (!%p1747_p0)
}
 0xe88   :  { %s1751_s23 = scalar_lea.hbm %s2157_s8, 32 }
 0xe89   :  { %p1752_p1 = scmp.ne.s32.totalorder %s2157_s8, %s1751_s23  ;;  %p1755_p2 = scmp.lt.u32.totalorder %s1751_s23, %s2157_s8 }
 0xe8b   :  { %p1757_p3 = pnand %p1755_p2, %p1752_p1 }
 0xe8d   :  { %1760 = shalt.err (!%p1757_p3)
}
 0xe8e   :  { %1405 = dma.vmem_to_hbm [thread:$0]  %s1403_s20, 32, %s2157_s8, [#allocation11]   ;;  %v1291_v26 = vld [vmem:[#allocation2] sm:$0xff]  ;;  %v1292_v30 = vld [vmem:[#allocation2 + $0x8] sm:$0xff] }
 0xe8f   :  { %v1442_v34 = vld [vmem:[%s2155_s6] ss:$0 sm:$0xff]  ;;  %s1811_s30 = smov [#allocation9]  }
 0xe90   :  { %s1389_s9 = sshll.u32 %s1811_s30, 4  ;;  %s1390_s9 = int_to_ptr.vmem [resolvable:$true] %s1389_s9 }
 0xe91   :  { %s1761_s8 = scalar_lea.vmem %s1390_s9, 256  ;;  %p1766_p5 = scmp.lt.s32.totalorder %s1390_s9, %s1390_s9 }
 0xe92   :  { %p1762_p4 = scmp.ne.s32.totalorder %s1390_s9, %s1761_s8  ;;  %p1767_p6 = scmp.lt.s32.totalorder %s1761_s8, %s1761_s8 }
 0xe94   :  { %p1768_p7 = por %p1767_p6, %p1766_p5 }
 0xe96   :  { %p1769_p8 = pnand %p1768_p7, %p1762_p4 }
 0xf59   :  { %v1335_v27 = vpop.f32.mrb[40].mxu0 }
 0xf5a   :  { %v1342_v28 = vadd.f32 %v1335_v27, %v1291_v26  ;;  %v1612_v29 = vpop.f32.mrb[41].mxu0 }
 0xf5b   :  { %v1338_v31 = vpop.f32.mrb[42].mxu0 }
 0xf5c   :  { %1344 = vst.msk [vmem:[#allocation2] sm:$0xff] %vm72_vm0, %v1342_v28  ;;  %v1343_v32 = vadd.f32 %v1338_v31, %v1292_v30  ;;  %v1613_v33 = vpop.f32.mrb[43].mxu0 }
 0xf5e   :  { %1345 = vst.msk [vmem:[#allocation2 + $0x8] sm:$0xff] %vm72_vm0, %v1343_v32 }
 0xf63   :  { %v1362_v35 = vld [vmem:[#allocation2] sm:$0xff] }
 0xf64   :  { %v1371_v16 = vadd.f32 %v1442_v34, %v1362_v35 }
 0xf65   :  { %v1363_v36 = vld [vmem:[#allocation2 + $0x8] sm:$0xff] }
 0xf66   :  { %v1372_v37 = vadd.f32 %v1442_v34, %v1363_v36  ;;  %1373 = vst.msk [vmem:[#allocation9] sm:$0xff] %vm72_vm0, %v1371_v16 }
 0xf68   :  { %1374 = vst.msk [vmem:[#allocation9 + $0x8] sm:$0xff] %vm72_vm0, %v1372_v37 }
 0xf69   :  { %1772 = shalt.err (!%p1769_p8)
}
 0xf6a   :  { %s1773_s11 = scalar_lea.hbm %s2156_s7, 256 }
 0xf6b   :  { %p1774_p9 = scmp.ne.s32.totalorder %s2156_s7, %s1773_s11  ;;  %p1777_p10 = scmp.lt.u32.totalorder %s1773_s11, %s2156_s7 }
 0xf6d   :  { %p1779_p11 = pnand %p1777_p10, %p1774_p9 }
 0xf6f   :  { %1782 = shalt.err (!%p1779_p11)
}
 0xf70   :  { %1395 = dma.vmem_to_hbm [thread:$0]  %s1390_s9, 256, %s2156_s7, [#allocation5], %s1795_s3, %s1795_s3, %s1796_s28  }
 0xf71   :  { %1787 = dma.done.wait [#allocation5], 256  }
 0xf72   :  { %1788 = vsyncadd [#allocation5], 4294967040 }
 0xf73   :  { %1789 = dma.done.wait [#allocation11], 32  }
 0xf74   :  { %1790 = vsyncadd [#allocation11], 4294967264 }
 0xf75   :  { %1412 = vsyncpa [#allocation4], 1 }
 0xf76   :  { %1413 = vsyncpa [#allocation7], 1 }
 0xf77   :  { %1414 = vsyncpa [#allocation5], 1 }
 0xf78   :  { %1415 = vsyncpa [#allocation11], 1 }

</bundles_post_ra>
